<compile_context>
chip_gen: v7x
topology: tpu7x:2x2x1
jax: 0.10.0
libtpu: 0.0.40
codegen_flags: <defaults>
</compile_context>

<pallas_src>
import jax
import jax.numpy as jnp
from jax import lax
from jax.experimental import pallas as pl
from jax.experimental.pallas import tpu as pltpu
import numpy as np

# ----- module hyperparameters (assert channel < 7 in torch code) -----
CHANNEL = 3          # -> ch_1 = 3, ch_2 = 4
CH1 = CHANNEL
CH2 = 7 - CHANNEL
MID = 16             # fc_1 / fc_2 output channels (nch in torch forward)
INPUT_DIM = 16       # L (qry_dim / con_dim)
EMBED_DIM = 32       # E
BATCH = 16

F32 = jnp.float32
SCALE = MID ** (-0.5)


def attn_res_block(x, params, batch_tile=None):
    """x: [B, 7, L] float32  ->  [B, CH1, L] float32 (== torch AttnResBlock)."""
    B, C, L = x.shape
    assert C == 7 and L == INPUT_DIM
    E = EMBED_DIM
    (w1, w2, wq, bq, wk, bk, wv, bv, wo, bo, w3) = params

    # Batch tile: 8 elements/step stacks 256 projection rows (fills a 256-wide
    # MXU) while keeping >=2 grid steps for v7x's two TensorCores. Otherwise
    # collapse to a single fat step (block == full array, always legal).
    if batch_tile is None:
        batch_tile = 8 if (B % 8 == 0 and B >= 16) else B
    bt = batch_tile
    assert B % bt == 0
    assert (bt * L) % 128 == 0 or bt == B, "output block must be lane-dense or full"
    n_tiles = B // bt

    # ---------- host-side weight fusion / constant folding (all tiny) ----------
    # Per-element block-diagonal conv weight, padded to 8 input channels so the
    # batch-flattened x tile keeps 8-row (sublane-aligned) strides per element.
    w12 = jnp.zeros((2 * MID, 8), F32)
    w12 = w12.at[0:MID, 0:CH1].set(w1)               # fc_1 rows act on p channels
    w12 = w12.at[MID:2 * MID, 3:3 + CH2].set(w2)     # fc_2 rows act on c channels
    wbig = jnp.kron(jnp.eye(bt, dtype=F32), w12)     # [bt*32, bt*8]: whole tile in one dot

    # Fused Q|K|V projection (pre-transposed to [L, 3E]); softmax scale folded into Q.
    wqkv = jnp.concatenate([(SCALE * wq).T, wk.T, wv.T], axis=1)        # [L, 3E]
    bqkv = jnp.concatenate([SCALE * bq, bk, bv]).reshape(1, 3 * E)      # [1, 3E]
    woT = wo.T                                                           # [E, L]
    b3 = jnp.sum(w3, axis=1)[:, None] * bo[None, :]                      # [CH1, L] = w3 @ (1 * bo)

    # ---------- pack every weight into one padded slab (one DMA instead of 11) ----------
    WIDTH = max(3 * E, bt * 8, L)
    pieces = [wbig, wqkv, bqkv, woT, w3, b3]
    offs, rows, r = [], [], 0
    for a in pieces:
        a = jnp.pad(a, ((0, (-a.shape[0]) % 8), (0, WIDTH - a.shape[1])))
        offs.append(r)
        rows.append(a)
        r += a.shape[0]
    slab = jnp.concatenate(rows, axis=0)              # [R, WIDTH] f32
    R = slab.shape[0]
    o_wbig, o_wqkv, o_bqkv, o_wot, o_w3, o_b3 = offs

    # x padded to 8 channels per element and batch-flattened: row b*8 + c = x[b, c, :]
    x_pad = jnp.pad(x, ((0, 0), (0, 1), (0, 0))).reshape(B * 8, L)

    # ---------------------------- kernel ----------------------------
    def kernel(x_ref, w_ref, o_ref):
        X = x_ref[...]                                                # [bt*8, L]
        wbig_k = w_ref[o_wbig:o_wbig + bt * 2 * MID, 0:bt * 8]        # [bt*32, bt*8]
        wqkv_k = w_ref[o_wqkv:o_wqkv + L, 0:3 * E]                    # [L, 3E]
        bqkv_k = w_ref[o_bqkv:o_bqkv + 1, 0:3 * E]                    # [1, 3E]
        woT_k = w_ref[o_wot:o_wot + E, 0:L]                           # [E, L]
        w3_k = w_ref[o_w3:o_w3 + CH1, 0:MID]                          # [CH1, 16]
        b3_k = w_ref[o_b3:o_b3 + CH1, 0:L]                            # [CH1, L]

        # Fused 1x1 convs for the whole tile: rows b*32+0:16 = qm_b, +16:32 = cm_b.
        G = jnp.dot(wbig_k, X, preferred_element_type=F32)            # [bt*32, L]
        # Fused Q|K|V projection for the whole tile (scale already in Q columns).
        QKV = jnp.dot(G, wqkv_k, preferred_element_type=F32) + bqkv_k  # [bt*32, 3E]

        for b in range(bt):                                           # static unroll, tiny tiles
            r0 = b * 2 * MID
            q = QKV[r0:r0 + MID, 0:E]                                 # [16, E] (qm rows)
            k = QKV[r0 + MID:r0 + 2 * MID, E:2 * E]                   # [16, E] (cm rows)
            v = QKV[r0 + MID:r0 + 2 * MID, 2 * E:3 * E]               # [16, E]

            # attn_weights[e,f] = sum_n q[n,e] k[n,f]  (scale pre-folded)
            aw = lax.dot_general(q, k, (((0,), (0,)), ((), ())),
                                 preferred_element_type=F32)          # [E, E]
            aw = jnp.exp(aw - jnp.max(aw, axis=-1, keepdims=True))
            aw = aw * pl.reciprocal(jnp.sum(aw, axis=-1, keepdims=True), approx=True)

            # attn2[n,e] = sum_f v[n,f] aw[e,f]
            attn2 = lax.dot_general(v, aw, (((1,), (1,)), ((), ())),
                                    preferred_element_type=F32)       # [16, E]
            out_nb = jnp.dot(attn2, woT_k, preferred_element_type=F32)  # [16, L] (bias folded)
            y = jnp.dot(w3_k, out_nb, preferred_element_type=F32) + b3_k  # [CH1, L]

            p = X[b * 8:b * 8 + CH1, :]                               # residual slice
            o_ref[:, b * L:(b + 1) * L] = (p + y).astype(o_ref.dtype)

    out_flat = pl.pallas_call(
        kernel,
        out_shape=jax.ShapeDtypeStruct((CH1, B * L), x.dtype),
        grid_spec=pltpu.PrefetchScalarGridSpec(
            num_scalar_prefetch=0,
            grid=(n_tiles,),
            in_specs=[pl.BlockSpec((bt * 8, L), lambda t: (t, 0)),
                      pl.BlockSpec((R, WIDTH), lambda t: (0, 0))],
            out_specs=pl.BlockSpec((CH1, bt * L), lambda t: (0, t)),
        ),
        compiler_params=pltpu.CompilerParams(
            dimension_semantics=("parallel",)),
    )(x_pad, slab)

    # [CH1, B*L] -> [B, CH1, L]
    return jnp.transpose(out_flat.reshape(CH1, B, L), (1, 0, 2))


def ref_forward(x, params):
    """Pure-JAX reference mirroring the PyTorch forward."""
    (w1, w2, wq, bq, wk, bk, wv, bv, wo, bo, w3) = params
    p = x[:, :CH1, :]
    c = x[:, 3:3 + CH2, :]
    qm = jnp.einsum('oc,bcl->bol', w1, p)
    cm = jnp.einsum('oc,bcl->bol', w2, c)
    q = jnp.einsum('bnl,el->bne', qm, wq) + bq
    k = jnp.einsum('bnl,el->bne', cm, wk) + bk
    v = jnp.einsum('bnl,el->bne', cm, wv) + bv
    aw = jnp.einsum('bne,bnf->bef', q, k) * SCALE
    aw = jax.nn.softmax(aw, axis=-1)
    attn = jnp.einsum('bef,bnf->ben', aw, v)           # [B, E, 16]
    out = jnp.einsum('ben,le->bnl', attn, wo) + bo     # [B, 16, L]
    y = jnp.einsum('on,bnl->bol', w3, out)             # [B, ch1, L]
    return p + y


def make_params(key):
    ks = jax.random.split(key, 11)

    def init(k, shape, fan_in):
        bound = 1.0 / np.sqrt(fan_in)
        return jax.random.uniform(k, shape, F32, -bound, bound)

    w1 = init(ks[0], (MID, CH1), CH1)                      # Conv1d(ch1, 16, 1), no bias
    w2 = init(ks[1], (MID, CH2), CH2)                      # Conv1d(ch2, 16, 1), no bias
    wq = init(ks[2], (EMBED_DIM, INPUT_DIM), INPUT_DIM)
    bq = init(ks[3], (EMBED_DIM,), INPUT_DIM)
    wk = init(ks[4], (EMBED_DIM, INPUT_DIM), INPUT_DIM)
    bk = init(ks[5], (EMBED_DIM,), INPUT_DIM)
    wv = init(ks[6], (EMBED_DIM, INPUT_DIM), INPUT_DIM)
    bv = init(ks[7], (EMBED_DIM,), INPUT_DIM)
    wo = init(ks[8], (INPUT_DIM, EMBED_DIM), EMBED_DIM)    # out_proj
    bo = init(ks[9], (INPUT_DIM,), EMBED_DIM)
    w3 = init(ks[10], (CH1, MID), MID)                     # Conv1d(16, ch1, 1), no bias
    return (w1, w2, wq, bq, wk, bk, wv, bv, wo, bo, w3)


if __name__ == "__main__":
    key = jax.random.PRNGKey(0)
    kx, kp = jax.random.split(key)
    x = jax.random.normal(kx, (BATCH, 7, INPUT_DIM), F32)
    params = make_params(kp)

    out = attn_res_block(x, params)
    out = jax.block_until_ready(out)

    ref = jax.block_until_ready(ref_forward(x, params))
    # tolerance relaxed from 1e-5 because the softmax denominator uses the
    # approximate EUP reciprocal (pl.reciprocal(approx=True)).
    np.testing.assert_allclose(np.asarray(out), np.asarray(ref),
                               rtol=5e-3, atol=5e-3)
    print("KERNEL_OK")
</pallas_src>

<mosaic_0001>
module attributes {stable_mosaic.version = 11 : i64} {
  func.func @kernel(%arg0: i32, %arg1: memref<64x16xf32, #tpu.memory_space<vmem>>, %arg2: memref<328x96xf32, #tpu.memory_space<vmem>>, %arg3: memref<3x128xf32, #tpu.memory_space<vmem>>) attributes {dimension_semantics = [#tpu.dimension_semantics<parallel>], iteration_bounds = array<i64: 2>, scalar_prefetch = 0 : i64, scratch_operands = 0 : i64, tpu.core_type = #tpu.core_type<tc>, window_params = [{transform_indices = @transform_0, window_bounds = array<i64: 64, 16>}, {pipeline_mode = #tpu.pipeline_mode<synchronous>, transform_indices = @transform_1, window_bounds = array<i64: 328, 96>}, {transform_indices = @transform_2, window_bounds = array<i64: 3, 128>}]} {
    %c0 = arith.constant 0 : index
    %c0_0 = arith.constant 0 : index
    %0 = vector.load %arg1[%c0, %c0_0] : memref<64x16xf32, #tpu.memory_space<vmem>>, vector<64x16xf32>
    %c0_1 = arith.constant 0 : index
    %c0_2 = arith.constant 0 : index
    %1 = vector.load %arg2[%c0_1, %c0_2] : memref<328x96xf32, #tpu.memory_space<vmem>>, vector<256x64xf32>
    %c256 = arith.constant 256 : index
    %c0_3 = arith.constant 0 : index
    %2 = vector.load %arg2[%c256, %c0_3] : memref<328x96xf32, #tpu.memory_space<vmem>>, vector<16x96xf32>
    %c272 = arith.constant 272 : index
    %c0_4 = arith.constant 0 : index
    %3 = vector.load %arg2[%c272, %c0_4] : memref<328x96xf32, #tpu.memory_space<vmem>>, vector<1x96xf32>
    %c280 = arith.constant 280 : index
    %c0_5 = arith.constant 0 : index
    %4 = vector.load %arg2[%c280, %c0_5] : memref<328x96xf32, #tpu.memory_space<vmem>>, vector<32x16xf32>
    %c312 = arith.constant 312 : index
    %c0_6 = arith.constant 0 : index
    %5 = vector.load %arg2[%c312, %c0_6] : memref<328x96xf32, #tpu.memory_space<vmem>>, vector<3x16xf32>
    %c320 = arith.constant 320 : index
    %c0_7 = arith.constant 0 : index
    %6 = vector.load %arg2[%c320, %c0_7] : memref<328x96xf32, #tpu.memory_space<vmem>>, vector<3x16xf32>
    %cst = arith.constant dense<0.000000e+00> : vector<256x16xf32>
    %7 = tpu.matmul %1, %0, %cst {dimension_numbers = #tpu.dot_dimension_numbers<[1], [0], [0], [1], [0, 0, 1, 1], [], []>} : vector<256x64xf32>, vector<64x16xf32>, vector<256x16xf32> -> vector<256x16xf32>
    %cst_8 = arith.constant dense<0.000000e+00> : vector<256x96xf32>
    %8 = tpu.matmul %7, %2, %cst_8 {dimension_numbers = #tpu.dot_dimension_numbers<[1], [0], [0], [1], [0, 0, 1, 1], [], []>} : vector<256x16xf32>, vector<16x96xf32>, vector<256x96xf32> -> vector<256x96xf32>
    %9 = vector.broadcast %3 : vector<1x96xf32> to vector<256x96xf32>
    %10 = arith.addf %8, %9 : vector<256x96xf32>
    %11 = vector.extract_strided_slice %10 {offsets = [0, 0], sizes = [16, 32], strides = [1, 1]} : vector<256x96xf32> to vector<16x32xf32>
    %12 = vector.extract_strided_slice %10 {offsets = [16, 32], sizes = [16, 32], strides = [1, 1]} : vector<256x96xf32> to vector<16x32xf32>
    %13 = vector.extract_strided_slice %10 {offsets = [16, 64], sizes = [16, 32], strides = [1, 1]} : vector<256x96xf32> to vector<16x32xf32>
    %cst_9 = arith.constant dense<0.000000e+00> : vector<32x32xf32>
    %14 = tpu.matmul %11, %12, %cst_9 {dimension_numbers = #tpu.dot_dimension_numbers<[0], [0], [1], [1], [0, 1, 1, 1], [], []>} : vector<16x32xf32>, vector<16x32xf32>, vector<32x32xf32> -> vector<32x32xf32>
    %cst_10 = arith.constant dense<0xFF800000> : vector<32xf32>
    %15 = vector.multi_reduction <maximumf>, %14, %cst_10 [1] : vector<32x32xf32> to vector<32xf32>
    %16 = vector.shape_cast %15 : vector<32xf32> to vector<32x1xf32>
    %17 = vector.broadcast %16 : vector<32x1xf32> to vector<32x32xf32>
    %18 = arith.subf %14, %17 : vector<32x32xf32>
    %19 = math.exp %18 : vector<32x32xf32>
    %cst_11 = arith.constant dense<0.000000e+00> : vector<32xf32>
    %20 = vector.multi_reduction <add>, %19, %cst_11 [1] : vector<32x32xf32> to vector<32xf32>
    %21 = vector.shape_cast %20 : vector<32xf32> to vector<32x1xf32>
    %22 = tpu.reciprocal %21 {approx = true} : vector<32x1xf32> -> vector<32x1xf32>
    %23 = vector.broadcast %22 : vector<32x1xf32> to vector<32x32xf32>
    %24 = arith.mulf %19, %23 : vector<32x32xf32>
    %cst_12 = arith.constant dense<0.000000e+00> : vector<16x32xf32>
    %25 = tpu.matmul %13, %24, %cst_12 {dimension_numbers = #tpu.dot_dimension_numbers<[1], [1], [0], [0], [0, 0, 1, 0], [], []>} : vector<16x32xf32>, vector<32x32xf32>, vector<16x32xf32> -> vector<16x32xf32>
    %cst_13 = arith.constant dense<0.000000e+00> : vector<16x16xf32>
    %26 = tpu.matmul %25, %4, %cst_13 {dimension_numbers = #tpu.dot_dimension_numbers<[1], [0], [0], [1], [0, 0, 1, 1], [], []>} : vector<16x32xf32>, vector<32x16xf32>, vector<16x16xf32> -> vector<16x16xf32>
    %cst_14 = arith.constant dense<0.000000e+00> : vector<3x16xf32>
    %27 = tpu.matmul %5, %26, %cst_14 {dimension_numbers = #tpu.dot_dimension_numbers<[1], [0], [0], [1], [0, 0, 1, 1], [], []>} : vector<3x16xf32>, vector<16x16xf32>, vector<3x16xf32> -> vector<3x16xf32>
    %28 = arith.addf %27, %6 : vector<3x16xf32>
    %29 = vector.extract_strided_slice %0 {offsets = [0, 0], sizes = [3, 16], strides = [1, 1]} : vector<64x16xf32> to vector<3x16xf32>
    %30 = arith.addf %29, %28 : vector<3x16xf32>
    %c0_15 = arith.constant 0 : index
    %c0_16 = arith.constant 0 : index
    %31 = vector.load %arg3[%c0_15, %c0_16] : memref<3x128xf32, #tpu.memory_space<vmem>>, vector<3x16xf32>
    tpu.vector_store %arg3[%c0_15, %c0_16], %30 {strides = array<i32>} : memref<3x128xf32, #tpu.memory_space<vmem>>, vector<3x16xf32>,
    %32 = vector.extract_strided_slice %10 {offsets = [32, 0], sizes = [16, 32], strides = [1, 1]} : vector<256x96xf32> to vector<16x32xf32>
    %33 = vector.extract_strided_slice %10 {offsets = [48, 32], sizes = [16, 32], strides = [1, 1]} : vector<256x96xf32> to vector<16x32xf32>
    %34 = vector.extract_strided_slice %10 {offsets = [48, 64], sizes = [16, 32], strides = [1, 1]} : vector<256x96xf32> to vector<16x32xf32>
    %cst_17 = arith.constant dense<0.000000e+00> : vector<32x32xf32>
    %35 = tpu.matmul %32, %33, %cst_17 {dimension_numbers = #tpu.dot_dimension_numbers<[0], [0], [1], [1], [0, 1, 1, 1], [], []>} : vector<16x32xf32>, vector<16x32xf32>, vector<32x32xf32> -> vector<32x32xf32>
    %cst_18 = arith.constant dense<0xFF800000> : vector<32xf32>
    %36 = vector.multi_reduction <maximumf>, %35, %cst_18 [1] : vector<32x32xf32> to vector<32xf32>
    %37 = vector.shape_cast %36 : vector<32xf32> to vector<32x1xf32>
    %38 = vector.broadcast %37 : vector<32x1xf32> to vector<32x32xf32>
    %39 = arith.subf %35, %38 : vector<32x32xf32>
    %40 = math.exp %39 : vector<32x32xf32>
    %cst_19 = arith.constant dense<0.000000e+00> : vector<32xf32>
    %41 = vector.multi_reduction <add>, %40, %cst_19 [1] : vector<32x32xf32> to vector<32xf32>
    %42 = vector.shape_cast %41 : vector<32xf32> to vector<32x1xf32>
    %43 = tpu.reciprocal %42 {approx = true} : vector<32x1xf32> -> vector<32x1xf32>
    %44 = vector.broadcast %43 : vector<32x1xf32> to vector<32x32xf32>
    %45 = arith.mulf %40, %44 : vector<32x32xf32>
    %cst_20 = arith.constant dense<0.000000e+00> : vector<16x32xf32>
    %46 = tpu.matmul %34, %45, %cst_20 {dimension_numbers = #tpu.dot_dimension_numbers<[1], [1], [0], [0], [0, 0, 1, 0], [], []>} : vector<16x32xf32>, vector<32x32xf32>, vector<16x32xf32> -> vector<16x32xf32>
    %cst_21 = arith.constant dense<0.000000e+00> : vector<16x16xf32>
    %47 = tpu.matmul %46, %4, %cst_21 {dimension_numbers = #tpu.dot_dimension_numbers<[1], [0], [0], [1], [0, 0, 1, 1], [], []>} : vector<16x32xf32>, vector<32x16xf32>, vector<16x16xf32> -> vector<16x16xf32>
    %cst_22 = arith.constant dense<0.000000e+00> : vector<3x16xf32>
    %48 = tpu.matmul %5, %47, %cst_22 {dimension_numbers = #tpu.dot_dimension_numbers<[1], [0], [0], [1], [0, 0, 1, 1], [], []>} : vector<3x16xf32>, vector<16x16xf32>, vector<3x16xf32> -> vector<3x16xf32>
    %49 = arith.addf %48, %6 : vector<3x16xf32>
    %50 = vector.extract_strided_slice %0 {offsets = [8, 0], sizes = [3, 16], strides = [1, 1]} : vector<64x16xf32> to vector<3x16xf32>
    %51 = arith.addf %50, %49 : vector<3x16xf32>
    %c0_23 = arith.constant 0 : index
    %c16 = arith.constant 16 : index
    %52 = vector.load %arg3[%c0_23, %c16] : memref<3x128xf32, #tpu.memory_space<vmem>>, vector<3x16xf32>
    tpu.vector_store %arg3[%c0_23, %c16], %51 {strides = array<i32>} : memref<3x128xf32, #tpu.memory_space<vmem>>, vector<3x16xf32>,
    %53 = vector.extract_strided_slice %10 {offsets = [64, 0], sizes = [16, 32], strides = [1, 1]} : vector<256x96xf32> to vector<16x32xf32>
    %54 = vector.extract_strided_slice %10 {offsets = [80, 32], sizes = [16, 32], strides = [1, 1]} : vector<256x96xf32> to vector<16x32xf32>
    %55 = vector.extract_strided_slice %10 {offsets = [80, 64], sizes = [16, 32], strides = [1, 1]} : vector<256x96xf32> to vector<16x32xf32>
    %cst_24 = arith.constant dense<0.000000e+00> : vector<32x32xf32>
    %56 = tpu.matmul %53, %54, %cst_24 {dimension_numbers = #tpu.dot_dimension_numbers<[0], [0], [1], [1], [0, 1, 1, 1], [], []>} : vector<16x32xf32>, vector<16x32xf32>, vector<32x32xf32> -> vector<32x32xf32>
    %cst_25 = arith.constant dense<0xFF800000> : vector<32xf32>
    %57 = vector.multi_reduction <maximumf>, %56, %cst_25 [1] : vector<32x32xf32> to vector<32xf32>
    %58 = vector.shape_cast %57 : vector<32xf32> to vector<32x1xf32>
    %59 = vector.broadcast %58 : vector<32x1xf32> to vector<32x32xf32>
    %60 = arith.subf %56, %59 : vector<32x32xf32>
    %61 = math.exp %60 : vector<32x32xf32>
    %cst_26 = arith.constant dense<0.000000e+00> : vector<32xf32>
    %62 = vector.multi_reduction <add>, %61, %cst_26 [1] : vector<32x32xf32> to vector<32xf32>
    %63 = vector.shape_cast %62 : vector<32xf32> to vector<32x1xf32>
    %64 = tpu.reciprocal %63 {approx = true} : vector<32x1xf32> -> vector<32x1xf32>
    %65 = vector.broadcast %64 : vector<32x1xf32> to vector<32x32xf32>
    %66 = arith.mulf %61, %65 : vector<32x32xf32>
    %cst_27 = arith.constant dense<0.000000e+00> : vector<16x32xf32>
    %67 = tpu.matmul %55, %66, %cst_27 {dimension_numbers = #tpu.dot_dimension_numbers<[1], [1], [0], [0], [0, 0, 1, 0], [], []>} : vector<16x32xf32>, vector<32x32xf32>, vector<16x32xf32> -> vector<16x32xf32>
    %cst_28 = arith.constant dense<0.000000e+00> : vector<16x16xf32>
    %68 = tpu.matmul %67, %4, %cst_28 {dimension_numbers = #tpu.dot_dimension_numbers<[1], [0], [0], [1], [0, 0, 1, 1], [], []>} : vector<16x32xf32>, vector<32x16xf32>, vector<16x16xf32> -> vector<16x16xf32>
    %cst_29 = arith.constant dense<0.000000e+00> : vector<3x16xf32>
    %69 = tpu.matmul %5, %68, %cst_29 {dimension_numbers = #tpu.dot_dimension_numbers<[1], [0], [0], [1], [0, 0, 1, 1], [], []>} : vector<3x16xf32>, vector<16x16xf32>, vector<3x16xf32> -> vector<3x16xf32>
    %70 = arith.addf %69, %6 : vector<3x16xf32>
    %71 = vector.extract_strided_slice %0 {offsets = [16, 0], sizes = [3, 16], strides = [1, 1]} : vector<64x16xf32> to vector<3x16xf32>
    %72 = arith.addf %71, %70 : vector<3x16xf32>
    %c0_30 = arith.constant 0 : index
    %c32 = arith.constant 32 : index
    %73 = vector.load %arg3[%c0_30, %c32] : memref<3x128xf32, #tpu.memory_space<vmem>>, vector<3x16xf32>
    tpu.vector_store %arg3[%c0_30, %c32], %72 {strides = array<i32>} : memref<3x128xf32, #tpu.memory_space<vmem>>, vector<3x16xf32>,
    %74 = vector.extract_strided_slice %10 {offsets = [96, 0], sizes = [16, 32], strides = [1, 1]} : vector<256x96xf32> to vector<16x32xf32>
    %75 = vector.extract_strided_slice %10 {offsets = [112, 32], sizes = [16, 32], strides = [1, 1]} : vector<256x96xf32> to vector<16x32xf32>
    %76 = vector.extract_strided_slice %10 {offsets = [112, 64], sizes = [16, 32], strides = [1, 1]} : vector<256x96xf32> to vector<16x32xf32>
    %cst_31 = arith.constant dense<0.000000e+00> : vector<32x32xf32>
    %77 = tpu.matmul %74, %75, %cst_31 {dimension_numbers = #tpu.dot_dimension_numbers<[0], [0], [1], [1], [0, 1, 1, 1], [], []>} : vector<16x32xf32>, vector<16x32xf32>, vector<32x32xf32> -> vector<32x32xf32>
    %cst_32 = arith.constant dense<0xFF800000> : vector<32xf32>
    %78 = vector.multi_reduction <maximumf>, %77, %cst_32 [1] : vector<32x32xf32> to vector<32xf32>
    %79 = vector.shape_cast %78 : vector<32xf32> to vector<32x1xf32>
    %80 = vector.broadcast %79 : vector<32x1xf32> to vector<32x32xf32>
    %81 = arith.subf %77, %80 : vector<32x32xf32>
    %82 = math.exp %81 : vector<32x32xf32>
    %cst_33 = arith.constant dense<0.000000e+00> : vector<32xf32>
    %83 = vector.multi_reduction <add>, %82, %cst_33 [1] : vector<32x32xf32> to vector<32xf32>
    %84 = vector.shape_cast %83 : vector<32xf32> to vector<32x1xf32>
    %85 = tpu.reciprocal %84 {approx = true} : vector<32x1xf32> -> vector<32x1xf32>
    %86 = vector.broadcast %85 : vector<32x1xf32> to vector<32x32xf32>
    %87 = arith.mulf %82, %86 : vector<32x32xf32>
    %cst_34 = arith.constant dense<0.000000e+00> : vector<16x32xf32>
    %88 = tpu.matmul %76, %87, %cst_34 {dimension_numbers = #tpu.dot_dimension_numbers<[1], [1], [0], [0], [0, 0, 1, 0], [], []>} : vector<16x32xf32>, vector<32x32xf32>, vector<16x32xf32> -> vector<16x32xf32>
    %cst_35 = arith.constant dense<0.000000e+00> : vector<16x16xf32>
    %89 = tpu.matmul %88, %4, %cst_35 {dimension_numbers = #tpu.dot_dimension_numbers<[1], [0], [0], [1], [0, 0, 1, 1], [], []>} : vector<16x32xf32>, vector<32x16xf32>, vector<16x16xf32> -> vector<16x16xf32>
    %cst_36 = arith.constant dense<0.000000e+00> : vector<3x16xf32>
    %90 = tpu.matmul %5, %89, %cst_36 {dimension_numbers = #tpu.dot_dimension_numbers<[1], [0], [0], [1], [0, 0, 1, 1], [], []>} : vector<3x16xf32>, vector<16x16xf32>, vector<3x16xf32> -> vector<3x16xf32>
    %91 = arith.addf %90, %6 : vector<3x16xf32>
    %92 = vector.extract_strided_slice %0 {offsets = [24, 0], sizes = [3, 16], strides = [1, 1]} : vector<64x16xf32> to vector<3x16xf32>
    %93 = arith.addf %92, %91 : vector<3x16xf32>
    %c0_37 = arith.constant 0 : index
    %c48 = arith.constant 48 : index
    %94 = vector.load %arg3[%c0_37, %c48] : memref<3x128xf32, #tpu.memory_space<vmem>>, vector<3x16xf32>
    tpu.vector_store %arg3[%c0_37, %c48], %93 {strides = array<i32>} : memref<3x128xf32, #tpu.memory_space<vmem>>, vector<3x16xf32>,
    %95 = vector.extract_strided_slice %10 {offsets = [128, 0], sizes = [16, 32], strides = [1, 1]} : vector<256x96xf32> to vector<16x32xf32>
    %96 = vector.extract_strided_slice %10 {offsets = [144, 32], sizes = [16, 32], strides = [1, 1]} : vector<256x96xf32> to vector<16x32xf32>
    %97 = vector.extract_strided_slice %10 {offsets = [144, 64], sizes = [16, 32], strides = [1, 1]} : vector<256x96xf32> to vector<16x32xf32>
    %cst_38 = arith.constant dense<0.000000e+00> : vector<32x32xf32>
    %98 = tpu.matmul %95, %96, %cst_38 {dimension_numbers = #tpu.dot_dimension_numbers<[0], [0], [1], [1], [0, 1, 1, 1], [], []>} : vector<16x32xf32>, vector<16x32xf32>, vector<32x32xf32> -> vector<32x32xf32>
    %cst_39 = arith.constant dense<0xFF800000> : vector<32xf32>
    %99 = vector.multi_reduction <maximumf>, %98, %cst_39 [1] : vector<32x32xf32> to vector<32xf32>
    %100 = vector.shape_cast %99 : vector<32xf32> to vector<32x1xf32>
    %101 = vector.broadcast %100 : vector<32x1xf32> to vector<32x32xf32>
    %102 = arith.subf %98, %101 : vector<32x32xf32>
    %103 = math.exp %102 : vector<32x32xf32>
    %cst_40 = arith.constant dense<0.000000e+00> : vector<32xf32>
    %104 = vector.multi_reduction <add>, %103, %cst_40 [1] : vector<32x32xf32> to vector<32xf32>
    %105 = vector.shape_cast %104 : vector<32xf32> to vector<32x1xf32>
    %106 = tpu.reciprocal %105 {approx = true} : vector<32x1xf32> -> vector<32x1xf32>
    %107 = vector.broadcast %106 : vector<32x1xf32> to vector<32x32xf32>
    %108 = arith.mulf %103, %107 : vector<32x32xf32>
    %cst_41 = arith.constant dense<0.000000e+00> : vector<16x32xf32>
    %109 = tpu.matmul %97, %108, %cst_41 {dimension_numbers = #tpu.dot_dimension_numbers<[1], [1], [0], [0], [0, 0, 1, 0], [], []>} : vector<16x32xf32>, vector<32x32xf32>, vector<16x32xf32> -> vector<16x32xf32>
    %cst_42 = arith.constant dense<0.000000e+00> : vector<16x16xf32>
    %110 = tpu.matmul %109, %4, %cst_42 {dimension_numbers = #tpu.dot_dimension_numbers<[1], [0], [0], [1], [0, 0, 1, 1], [], []>} : vector<16x32xf32>, vector<32x16xf32>, vector<16x16xf32> -> vector<16x16xf32>
    %cst_43 = arith.constant dense<0.000000e+00> : vector<3x16xf32>
    %111 = tpu.matmul %5, %110, %cst_43 {dimension_numbers = #tpu.dot_dimension_numbers<[1], [0], [0], [1], [0, 0, 1, 1], [], []>} : vector<3x16xf32>, vector<16x16xf32>, vector<3x16xf32> -> vector<3x16xf32>
    %112 = arith.addf %111, %6 : vector<3x16xf32>
    %113 = vector.extract_strided_slice %0 {offsets = [32, 0], sizes = [3, 16], strides = [1, 1]} : vector<64x16xf32> to vector<3x16xf32>
    %114 = arith.addf %113, %112 : vector<3x16xf32>
    %c0_44 = arith.constant 0 : index
    %c64 = arith.constant 64 : index
    %115 = vector.load %arg3[%c0_44, %c64] : memref<3x128xf32, #tpu.memory_space<vmem>>, vector<3x16xf32>
    tpu.vector_store %arg3[%c0_44, %c64], %114 {strides = array<i32>} : memref<3x128xf32, #tpu.memory_space<vmem>>, vector<3x16xf32>,
    %116 = vector.extract_strided_slice %10 {offsets = [160, 0], sizes = [16, 32], strides = [1, 1]} : vector<256x96xf32> to vector<16x32xf32>
    %117 = vector.extract_strided_slice %10 {offsets = [176, 32], sizes = [16, 32], strides = [1, 1]} : vector<256x96xf32> to vector<16x32xf32>
    %118 = vector.extract_strided_slice %10 {offsets = [176, 64], sizes = [16, 32], strides = [1, 1]} : vector<256x96xf32> to vector<16x32xf32>
    %cst_45 = arith.constant dense<0.000000e+00> : vector<32x32xf32>
    %119 = tpu.matmul %116, %117, %cst_45 {dimension_numbers = #tpu.dot_dimension_numbers<[0], [0], [1], [1], [0, 1, 1, 1], [], []>} : vector<16x32xf32>, vector<16x32xf32>, vector<32x32xf32> -> vector<32x32xf32>
    %cst_46 = arith.constant dense<0xFF800000> : vector<32xf32>
    %120 = vector.multi_reduction <maximumf>, %119, %cst_46 [1] : vector<32x32xf32> to vector<32xf32>
    %121 = vector.shape_cast %120 : vector<32xf32> to vector<32x1xf32>
    %122 = vector.broadcast %121 : vector<32x1xf32> to vector<32x32xf32>
    %123 = arith.subf %119, %122 : vector<32x32xf32>
    %124 = math.exp %123 : vector<32x32xf32>
    %cst_47 = arith.constant dense<0.000000e+00> : vector<32xf32>
    %125 = vector.multi_reduction <add>, %124, %cst_47 [1] : vector<32x32xf32> to vector<32xf32>
    %126 = vector.shape_cast %125 : vector<32xf32> to vector<32x1xf32>
    %127 = tpu.reciprocal %126 {approx = true} : vector<32x1xf32> -> vector<32x1xf32>
    %128 = vector.broadcast %127 : vector<32x1xf32> to vector<32x32xf32>
    %129 = arith.mulf %124, %128 : vector<32x32xf32>
    %cst_48 = arith.constant dense<0.000000e+00> : vector<16x32xf32>
    %130 = tpu.matmul %118, %129, %cst_48 {dimension_numbers = #tpu.dot_dimension_numbers<[1], [1], [0], [0], [0, 0, 1, 0], [], []>} : vector<16x32xf32>, vector<32x32xf32>, vector<16x32xf32> -> vector<16x32xf32>
    %cst_49 = arith.constant dense<0.000000e+00> : vector<16x16xf32>
    %131 = tpu.matmul %130, %4, %cst_49 {dimension_numbers = #tpu.dot_dimension_numbers<[1], [0], [0], [1], [0, 0, 1, 1], [], []>} : vector<16x32xf32>, vector<32x16xf32>, vector<16x16xf32> -> vector<16x16xf32>
    %cst_50 = arith.constant dense<0.000000e+00> : vector<3x16xf32>
    %132 = tpu.matmul %5, %131, %cst_50 {dimension_numbers = #tpu.dot_dimension_numbers<[1], [0], [0], [1], [0, 0, 1, 1], [], []>} : vector<3x16xf32>, vector<16x16xf32>, vector<3x16xf32> -> vector<3x16xf32>
    %133 = arith.addf %132, %6 : vector<3x16xf32>
    %134 = vector.extract_strided_slice %0 {offsets = [40, 0], sizes = [3, 16], strides = [1, 1]} : vector<64x16xf32> to vector<3x16xf32>
    %135 = arith.addf %134, %133 : vector<3x16xf32>
    %c0_51 = arith.constant 0 : index
    %c80 = arith.constant 80 : index
    %136 = vector.load %arg3[%c0_51, %c80] : memref<3x128xf32, #tpu.memory_space<vmem>>, vector<3x16xf32>
    tpu.vector_store %arg3[%c0_51, %c80], %135 {strides = array<i32>} : memref<3x128xf32, #tpu.memory_space<vmem>>, vector<3x16xf32>,
    %137 = vector.extract_strided_slice %10 {offsets = [192, 0], sizes = [16, 32], strides = [1, 1]} : vector<256x96xf32> to vector<16x32xf32>
    %138 = vector.extract_strided_slice %10 {offsets = [208, 32], sizes = [16, 32], strides = [1, 1]} : vector<256x96xf32> to vector<16x32xf32>
    %139 = vector.extract_strided_slice %10 {offsets = [208, 64], sizes = [16, 32], strides = [1, 1]} : vector<256x96xf32> to vector<16x32xf32>
    %cst_52 = arith.constant dense<0.000000e+00> : vector<32x32xf32>
    %140 = tpu.matmul %137, %138, %cst_52 {dimension_numbers = #tpu.dot_dimension_numbers<[0], [0], [1], [1], [0, 1, 1, 1], [], []>} : vector<16x32xf32>, vector<16x32xf32>, vector<32x32xf32> -> vector<32x32xf32>
    %cst_53 = arith.constant dense<0xFF800000> : vector<32xf32>
    %141 = vector.multi_reduction <maximumf>, %140, %cst_53 [1] : vector<32x32xf32> to vector<32xf32>
    %142 = vector.shape_cast %141 : vector<32xf32> to vector<32x1xf32>
    %143 = vector.broadcast %142 : vector<32x1xf32> to vector<32x32xf32>
    %144 = arith.subf %140, %143 : vector<32x32xf32>
    %145 = math.exp %144 : vector<32x32xf32>
    %cst_54 = arith.constant dense<0.000000e+00> : vector<32xf32>
    %146 = vector.multi_reduction <add>, %145, %cst_54 [1] : vector<32x32xf32> to vector<32xf32>
    %147 = vector.shape_cast %146 : vector<32xf32> to vector<32x1xf32>
    %148 = tpu.reciprocal %147 {approx = true} : vector<32x1xf32> -> vector<32x1xf32>
    %149 = vector.broadcast %148 : vector<32x1xf32> to vector<32x32xf32>
    %150 = arith.mulf %145, %149 : vector<32x32xf32>
    %cst_55 = arith.constant dense<0.000000e+00> : vector<16x32xf32>
    %151 = tpu.matmul %139, %150, %cst_55 {dimension_numbers = #tpu.dot_dimension_numbers<[1], [1], [0], [0], [0, 0, 1, 0], [], []>} : vector<16x32xf32>, vector<32x32xf32>, vector<16x32xf32> -> vector<16x32xf32>
    %cst_56 = arith.constant dense<0.000000e+00> : vector<16x16xf32>
    %152 = tpu.matmul %151, %4, %cst_56 {dimension_numbers = #tpu.dot_dimension_numbers<[1], [0], [0], [1], [0, 0, 1, 1], [], []>} : vector<16x32xf32>, vector<32x16xf32>, vector<16x16xf32> -> vector<16x16xf32>
    %cst_57 = arith.constant dense<0.000000e+00> : vector<3x16xf32>
    %153 = tpu.matmul %5, %152, %cst_57 {dimension_numbers = #tpu.dot_dimension_numbers<[1], [0], [0], [1], [0, 0, 1, 1], [], []>} : vector<3x16xf32>, vector<16x16xf32>, vector<3x16xf32> -> vector<3x16xf32>
    %154 = arith.addf %153, %6 : vector<3x16xf32>
    %155 = vector.extract_strided_slice %0 {offsets = [48, 0], sizes = [3, 16], strides = [1, 1]} : vector<64x16xf32> to vector<3x16xf32>
    %156 = arith.addf %155, %154 : vector<3x16xf32>
    %c0_58 = arith.constant 0 : index
    %c96 = arith.constant 96 : index
    %157 = vector.load %arg3[%c0_58, %c96] : memref<3x128xf32, #tpu.memory_space<vmem>>, vector<3x16xf32>
    tpu.vector_store %arg3[%c0_58, %c96], %156 {strides = array<i32>} : memref<3x128xf32, #tpu.memory_space<vmem>>, vector<3x16xf32>,
    %158 = vector.extract_strided_slice %10 {offsets = [224, 0], sizes = [16, 32], strides = [1, 1]} : vector<256x96xf32> to vector<16x32xf32>
    %159 = vector.extract_strided_slice %10 {offsets = [240, 32], sizes = [16, 32], strides = [1, 1]} : vector<256x96xf32> to vector<16x32xf32>
    %160 = vector.extract_strided_slice %10 {offsets = [240, 64], sizes = [16, 32], strides = [1, 1]} : vector<256x96xf32> to vector<16x32xf32>
    %cst_59 = arith.constant dense<0.000000e+00> : vector<32x32xf32>
    %161 = tpu.matmul %158, %159, %cst_59 {dimension_numbers = #tpu.dot_dimension_numbers<[0], [0], [1], [1], [0, 1, 1, 1], [], []>} : vector<16x32xf32>, vector<16x32xf32>, vector<32x32xf32> -> vector<32x32xf32>
    %cst_60 = arith.constant dense<0xFF800000> : vector<32xf32>
    %162 = vector.multi_reduction <maximumf>, %161, %cst_60 [1] : vector<32x32xf32> to vector<32xf32>
    %163 = vector.shape_cast %162 : vector<32xf32> to vector<32x1xf32>
    %164 = vector.broadcast %163 : vector<32x1xf32> to vector<32x32xf32>
    %165 = arith.subf %161, %164 : vector<32x32xf32>
    %166 = math.exp %165 : vector<32x32xf32>
    %cst_61 = arith.constant dense<0.000000e+00> : vector<32xf32>
    %167 = vector.multi_reduction <add>, %166, %cst_61 [1] : vector<32x32xf32> to vector<32xf32>
    %168 = vector.shape_cast %167 : vector<32xf32> to vector<32x1xf32>
    %169 = tpu.reciprocal %168 {approx = true} : vector<32x1xf32> -> vector<32x1xf32>
    %170 = vector.broadcast %169 : vector<32x1xf32> to vector<32x32xf32>
    %171 = arith.mulf %166, %170 : vector<32x32xf32>
    %cst_62 = arith.constant dense<0.000000e+00> : vector<16x32xf32>
    %172 = tpu.matmul %160, %171, %cst_62 {dimension_numbers = #tpu.dot_dimension_numbers<[1], [1], [0], [0], [0, 0, 1, 0], [], []>} : vector<16x32xf32>, vector<32x32xf32>, vector<16x32xf32> -> vector<16x32xf32>
    %cst_63 = arith.constant dense<0.000000e+00> : vector<16x16xf32>
    %173 = tpu.matmul %172, %4, %cst_63 {dimension_numbers = #tpu.dot_dimension_numbers<[1], [0], [0], [1], [0, 0, 1, 1], [], []>} : vector<16x32xf32>, vector<32x16xf32>, vector<16x16xf32> -> vector<16x16xf32>
    %cst_64 = arith.constant dense<0.000000e+00> : vector<3x16xf32>
    %174 = tpu.matmul %5, %173, %cst_64 {dimension_numbers = #tpu.dot_dimension_numbers<[1], [0], [0], [1], [0, 0, 1, 1], [], []>} : vector<3x16xf32>, vector<16x16xf32>, vector<3x16xf32> -> vector<3x16xf32>
    %175 = arith.addf %174, %6 : vector<3x16xf32>
    %176 = vector.extract_strided_slice %0 {offsets = [56, 0], sizes = [3, 16], strides = [1, 1]} : vector<64x16xf32> to vector<3x16xf32>
    %177 = arith.addf %176, %175 : vector<3x16xf32>
    %c0_65 = arith.constant 0 : index
    %c112 = arith.constant 112 : index
    %178 = vector.load %arg3[%c0_65, %c112] : memref<3x128xf32, #tpu.memory_space<vmem>>, vector<3x16xf32>
    tpu.vector_store %arg3[%c0_65, %c112], %177 {strides = array<i32>} : memref<3x128xf32, #tpu.memory_space<vmem>>, vector<3x16xf32>,
    return
  }
  func.func @transform_0(%arg0: i32) -> (i32, i32) {
    %c0_i32 = arith.constant 0 : i32
    %c0_i32_0 = arith.constant 0 : i32
    return %arg0, %c0_i32 : i32, i32
  }
  func.func @transform_1(%arg0: i32) -> (i32, i32) {
    %c0_i32 = arith.constant 0 : i32
    %c0_i32_0 = arith.constant 0 : i32
    %c0_i32_1 = arith.constant 0 : i32
    return %c0_i32, %c0_i32_0 : i32, i32
  }
  func.func @transform_2(%arg0: i32) -> (i32, i32) {
    %c0_i32 = arith.constant 0 : i32
    %c0_i32_0 = arith.constant 0 : i32
    return %c0_i32, %arg0 : i32, i32
  }
}

</mosaic_0001>

<bundles_post_ra>
// kernel: tpu_custom_call.1
= control target key start
LH: loop header
LB: loop body
LE: loop exit
PB: predicated region body
PF: predicated region fallthrough
CT: control target
= control target key end

     0   :  { %7 = vsyncpa [#allocation3], 0  ;;  %s6627_s0 = inlined_call_operand.vmem [shape: f32[128,16], index: 0, kind: input, shape index: {}]   ;;  %s6628_s1 = inlined_call_operand.vmem [shape: f32[328,96], index: 1, kind: input, shape index: {}]   ;;  %s6629_s2 = inlined_call_operand.hbm [shape: f32[3,256], index: 2, kind: output, shape index: {}]  }
   0x1   :  { %9 = vsyncpa [#allocation3 + $0x1], 0  ;;  %s5789_s9 = smov 0   ;;  %s5791_s10 = smov 0  }
   0x2   :  { %s5793_s11 = smov 0   ;;  %s5795_s12 = smov 0  }
   0x3 LB: > { %s5810_s13 = sadd.s32 4294967295, %s5761_s12   ;;  %s4386_s14 = sadd.s32 4294967294, %s5761_s12   ;;  %s5761_s12 = sphi %s5795_s12, %s6637_s12   ;;  %s5757_s11 = sphi %s5793_s11, %s6636_s11   ;;  %s5753_s10 = sphi %s5791_s10, %s6635_s10   ;;  %s5749_s9 = sphi %s5789_s9, %s6634_s9  }
   0x4   : > { %s5814_s15 = sadd.s32 1, %s5761_s12   ;;  %s69_s16 = sadd.s32 1, %s5757_s11 }
   0x5   : > { %s66_s17 = ssub.s32 %s5761_s12, %s5814_s15  ;;  %p79_p0 = scmp.ne.s32.totalorder %s5757_s11, %s5753_s10 }
   0x6   : > { %p67_p1 = scmp.eq.s32.totalorder %s66_s17, 0  ;;  %p80_p2 = scmp.eq.s32.totalorder %s5810_s13, 1 }
   0x7   : > { %p85_p3 = scmp.ne.s32.totalorder %s5753_s10, %s5749_s9  ;;  %p86_p4 = scmp.eq.s32.totalorder %s4386_s14, 1 }
   0x8   : > { %s5825_s18 = scalar_select %p67_p1, %s5757_s11, %s69_s16  }
   0x9   : > { %p5827_p5 = por %p80_p2, %p79_p0  ;;  %p5831_p6 = por %p86_p4, %p85_p3 }
   0xa   : > { %p4389_p7 = scmp.ge.s32.totalorder %s5761_s12, 1  ;;  %p116_p8 = scmp.lt.s32.totalorder %s5761_s12, 3 }
   0xc   : > { %p117_p9 = pnand %p4389_p7, %p116_p8 }
   0xd   : > { %s4391_s21 = sshll.u32 (!%p117_p9), %s5810_s13, 3  ;;  %v152_v0 = vld [vmem:[%s6628_s1] sm:$0xff] (!%p117_p9)  ;;  %vm193_vm0 = vcmask (!%p117_p9), 523264   ;;  %v185_v2 = vld [vmem:[%s6628_s1 + $0x108] sm:$0xff] (!%p117_p9)  ;;  %v154_v17 = vld [vmem:[%s6628_s1 + $0x10] sm:$0xff] (!%p117_p9)  ;;  %vm519_vm1 = vcmask (!%p117_p9), 130048  }
   0xe   : > { %120 = sbr.rel (%p117_p9) target bundleno = 8461 (0x210d), region = 28  ;;  %p139_p10 = scmp.lt.s32.totalorder (!%p117_p9), %s4391_s21, 15  ;;  %4824 = vmatprep.mubr.msk.f32.mxu0 (!%p117_p9), %vm193_vm0, %v152_v0  ;;  %v184_v1 = vld [vmem:[%s6628_s1 + $0x100] sm:$0xff] (!%p117_p9)  ;;  %v153_v16 = vld [vmem:[%s6628_s1 + $0x8] sm:$0xff] (!%p117_p9)  ;;  %v155_v18 = vld [vmem:[%s6628_s1 + $0x18] sm:$0xff] (!%p117_p9)  ;;  %vm978_vm2 = vcmask (!%p117_p9), 261120  }
   0xf   : > { %v5252_v3 = vpack.c.bf16 (!%p117_p9), %v185_v2, %v184_v1  ;;  %v156_v19 = vld [vmem:[%s6628_s1 + $0x20] sm:$0xff] (!%p117_p9)  ;;  %v157_v20 = vld [vmem:[%s6628_s1 + $0x28] sm:$0xff] (!%p117_p9)  ;;  %v158_v21 = vld [vmem:[%s6628_s1 + $0x30] sm:$0xff] (!%p117_p9)  ;;  %s5763_s23 = smov (!%p117_p9), 96   ;;  %s5764_s24 = smov (!%p117_p9), 64   ;;  %vm5766_vm4 = vmmov (!%p117_p9), 0  }
  0x10   : > { %v159_v22 = vld [vmem:[%s6628_s1 + $0x38] sm:$0xff] (!%p117_p9)  ;;  %v160_v23 = vld [vmem:[%s6628_s1 + $0x40] sm:$0xff] (!%p117_p9)  ;;  %v161_v24 = vld [vmem:[%s6628_s1 + $0x48] sm:$0xff] (!%p117_p9)  ;;  %s135_s8 = sand.u32 (!%p117_p9), 1, %s5753_s10   ;;  %vm1273_vm5 = vcmask (!%p117_p9), 124928   ;;  %s5768_s30 = smov (!%p117_p9), 16  }
  0x11   : > { %5253 = vmatprep.subr.bf16.mxu1 (!%p117_p9), %v5252_v3  ;;  %v162_v25 = vld [vmem:[%s6628_s1 + $0x50] sm:$0xff] (!%p117_p9)  ;;  %v163_v26 = vld [vmem:[%s6628_s1 + $0x58] sm:$0xff] (!%p117_p9)  ;;  %v164_v27 = vld [vmem:[%s6628_s1 + $0x60] sm:$0xff] (!%p117_p9)  ;;  %s4390_s17 = sshll.u32 (!%p117_p9), %s135_s8, 2  ;;  %vm1707_vm6 = vcmask (!%p117_p9), 256128   ;;  %s5769_s4 = smov (!%p117_p9), 32  }
  0x12   : > { %5255 = vmatpush3.bf16.msra.mxu1 (!%p117_p9), %v5252_v3  ;;  %v165_v28 = vld [vmem:[%s6628_s1 + $0x68] sm:$0xff] (!%p117_p9)  ;;  %v166_v29 = vld [vmem:[%s6628_s1 + $0x70] sm:$0xff] (!%p117_p9)  ;;  %v167_v30 = vld [vmem:[%s6628_s1 + $0x78] sm:$0xff] (!%p117_p9)  ;;  %s5770_s5 = smov (!%p117_p9), 48   ;;  %s5771_s6 = smov (!%p117_p9), 80   ;;  %vm2141_vm7 = vcmask (!%p117_p9), 387328  }
  0x13   : > { %v168_v31 = vld [vmem:[%s6628_s1 + $0x80] sm:$0xff] (!%p117_p9)  ;;  %v169_v32 = vld [vmem:[%s6628_s1 + $0x88] sm:$0xff] (!%p117_p9)  ;;  %v170_v33 = vld [vmem:[%s6628_s1 + $0x90] sm:$0xff] (!%p117_p9)  ;;  %vm2575_vm8 = vcmask (!%p117_p9), 518528   ;;  %vm3009_vm9 = vcmask (!%p117_p9), 649728   ;;  %vm3443_vm10 = vcmask (!%p117_p9), 780928  }
  0x14   : > { %v171_v34 = vld [vmem:[%s6628_s1 + $0x98] sm:$0xff] (!%p117_p9)  ;;  %v172_v35 = vld [vmem:[%s6628_s1 + $0xa0] sm:$0xff] (!%p117_p9)  ;;  %v173_v36 = vld [vmem:[%s6628_s1 + $0xa8] sm:$0xff] (!%p117_p9)  ;;  %vm3877_vm11 = vcmask (!%p117_p9), 912128   ;;  %vm4311_vm12 = vcmask (!%p117_p9), 1043328  }
  0x15   : > { %s6639_s21 = smov (!%p139_p10, %s4391_s21), 15  ;;  %v174_v37 = vld [vmem:[%s6628_s1 + $0xb0] sm:$0xff]  ;;  %v175_v38 = vld [vmem:[%s6628_s1 + $0xb8] sm:$0xff]  ;;  %v176_v39 = vld [vmem:[%s6628_s1 + $0xc0] sm:$0xff] }
  0x16   : > { %s4392_s28 = sshll.u32 %s6639_s21, 3  ;;  %v177_v40 = vld [vmem:[%s6628_s1 + $0xc8] sm:$0xff]  ;;  %v178_v41 = vld [vmem:[%s6628_s1 + $0xd0] sm:$0xff]  ;;  %v179_v42 = vld [vmem:[%s6628_s1 + $0xd8] sm:$0xff]  ;;  %s6220_s21 = scalar_lea.vmem [#allocation2], %s4390_s17 }
  0x17   : > { %s5851_s3 = scalar_lea.vmem %s6627_s0, %s4392_s28  ;;  %v180_v43 = vld [vmem:[%s6628_s1 + $0xe0] sm:$0xff]  ;;  %v181_v44 = vld [vmem:[%s6628_s1 + $0xe8] sm:$0xff]  ;;  %v182_v45 = vld [vmem:[%s6628_s1 + $0xf0] sm:$0xff]  ;;  %s4327_s7 = sshll.u32 %s6220_s21, 4  ;;  %s6584_s7 = int_to_ptr.vmem [resolvable:$true] %s4327_s7 }
  0x18   : > { %v5854_v4 = vld [vmem:[%s5851_s3] sm:$0xff]  ;;  %v145_v5 = vld [vmem:[%s5851_s3 + $0x8] sm:$0xff]  ;;  %v146_v6 = vld [vmem:[%s5851_s3 + $0x10] sm:$0xff]  ;;  %s5699_s22 = scalar_lea.vmem %s6584_s7, 64 }
  0x19   : > { %v5236_v7 = vpack.c.bf16 %v145_v5, %v5854_v4  ;;  %v147_v8 = vld [vmem:[%s5851_s3 + $0x18] sm:$0xff]  ;;  %v148_v10 = vld [vmem:[%s5851_s3 + $0x20] sm:$0xff]  ;;  %v149_v11 = vld [vmem:[%s5851_s3 + $0x28] sm:$0xff]  ;;  %p5700_p11 = scmp.ne.s32.totalorder %s6584_s7, %s5699_s22 }
  0x1a   : > { %v5240_v9 = vpack.c.bf16 %v147_v8, %v146_v6  ;;  %v5244_v12 = vpack.c.bf16 %v149_v11, %v148_v10  ;;  %v150_v13 = vld [vmem:[%s5851_s3 + $0x30] sm:$0xff]  ;;  %v151_v14 = vld [vmem:[%s5851_s3 + $0x38] sm:$0xff]  ;;  %vm6141_vm3 = vmpackc.low %vm978_vm2, %vm978_vm2 }
  0x1b   : > { %5237 = vmatprep.subr.bf16.mxu0 %v5236_v7  ;;  %v5248_v15 = vpack.c.bf16 %v151_v14, %v150_v13  ;;  %v183_v46 = vld [vmem:[%s6628_s1 + $0xf8] sm:$0xff]  ;;  %v6005_v1 = vld [vmem:[%s6628_s1 + $0x110] ss:$0 sm:$0xff]  ;;  %p5701_p12 = pnand %p5700_p11, %p5827_p5 }
  0x1c   : > { %5239 = vmatpush3.bf16.msra.mxu0 %v5236_v7 }
  0x1d   : > { %5241 = vmatprep.subr.bf16.mxu0 %v5240_v9  ;;  %p5702_p13 = pneg %p5701_p12 }
  0x20   : > { %5243 = vmatpush3.bf16.msra.mxu0 %v5240_v9 }
  0x21   : > { %5245 = vmatprep.subr.bf16.mxu0 %v5244_v12 }
  0x24   : > { %5247 = vmatpush3.bf16.msra.mxu0 %v5244_v12 }
  0x25   : > { %5249 = vmatprep.subr.bf16.mxu0 %v5248_v15 }
  0x28   : > { %5251 = vmatpush3.bf16.msra.mxu0 %v5248_v15 }
  0x2b   : > { %4825 = vmatmul.mubr.msk.f32.vlgmr.msra.gmra.mrb[0].mxu0 %vm193_vm0, %v153_v16 }
  0x2c   : > { %4827 = vmatprep.mubr.msk.f32.mxu0 %vm193_vm0, %v154_v17 }
  0x2f   : > { %4828 = vmatmul.mubr.msk.f32.gmra.mrb[2].mxu0 %vm193_vm0, %v155_v18 }
  0x30   : > { %4830 = vmatprep.mubr.msk.f32.mxu0 %vm193_vm0, %v156_v19 }
  0x33   : > { %4831 = vmatmul.mubr.msk.f32.gmra.mrb[4].mxu0 %vm193_vm0, %v157_v20 }
  0x34   : > { %4833 = vmatprep.mubr.msk.f32.mxu0 %vm193_vm0, %v158_v21 }
  0x37   : > { %4834 = vmatmul.mubr.msk.f32.gmra.mrb[6].mxu0 %vm193_vm0, %v159_v22 }
  0x38   : > { %4836 = vmatprep.mubr.msk.f32.mxu0 %vm193_vm0, %v160_v23 }
  0x3b   : > { %4837 = vmatmul.mubr.msk.f32.gmra.mrb[8].mxu0 %vm193_vm0, %v161_v24 }
  0x3c   : > { %4839 = vmatprep.mubr.msk.f32.mxu0 %vm193_vm0, %v162_v25 }
  0x3f   : > { %4840 = vmatmul.mubr.msk.f32.gmra.mrb[10].mxu0 %vm193_vm0, %v163_v26 }
  0x40   : > { %4842 = vmatprep.mubr.msk.f32.mxu0 %vm193_vm0, %v164_v27 }
  0x43   : > { %4843 = vmatmul.mubr.msk.f32.gmra.mrb[12].mxu0 %vm193_vm0, %v165_v28 }
  0x44   : > { %4845 = vmatprep.mubr.msk.f32.mxu0 %vm193_vm0, %v166_v29 }
  0x47   : > { %4846 = vmatmul.mubr.msk.f32.gmra.mrb[14].mxu0 %vm193_vm0, %v167_v30 }
  0x48   : > { %4848 = vmatprep.mubr.msk.f32.mxu0 %vm193_vm0, %v168_v31 }
  0x4b   : > { %4849 = vmatmul.mubr.msk.f32.gmra.mrb[16].mxu0 %vm193_vm0, %v169_v32 }
  0x4c   : > { %4851 = vmatprep.mubr.msk.f32.mxu0 %vm193_vm0, %v170_v33 }
  0x4f   : > { %4852 = vmatmul.mubr.msk.f32.gmra.mrb[18].mxu0 %vm193_vm0, %v171_v34 }
  0x50   : > { %4854 = vmatprep.mubr.msk.f32.mxu0 %vm193_vm0, %v172_v35 }
  0x53   : > { %4855 = vmatmul.mubr.msk.f32.gmra.mrb[20].mxu0 %vm193_vm0, %v173_v36 }
  0x54   : > { %4857 = vmatprep.mubr.msk.f32.mxu0 %vm193_vm0, %v174_v37 }
  0x57   : > { %4858 = vmatmul.mubr.msk.f32.gmra.mrb[22].mxu0 %vm193_vm0, %v175_v38 }
  0x58   : > { %4860 = vmatprep.mubr.msk.f32.mxu0 %vm193_vm0, %v176_v39 }
  0x5b   : > { %4861 = vmatmul.mubr.msk.f32.gmra.mrb[24].mxu0 %vm193_vm0, %v177_v40 }
  0x5c   : > { %4863 = vmatprep.mubr.msk.f32.mxu0 %vm193_vm0, %v178_v41 }
  0x5f   : > { %4864 = vmatmul.mubr.msk.f32.gmra.mrb[26].mxu0 %vm193_vm0, %v179_v42 }
  0x60   : > { %4866 = vmatprep.mubr.msk.f32.mxu0 %vm193_vm0, %v180_v43 }
  0x63   : > { %4867 = vmatmul.mubr.msk.f32.gmra.mrb[28].mxu0 %vm193_vm0, %v181_v44 }
  0x64   : > { %4869 = vmatprep.mubr.msk.f32.mxu0 %vm193_vm0, %v182_v45 }
  0x67   : > { %4870 = vmatmul.mubr.msk.f32.gmra.mrb[30].mxu0 %vm193_vm0, %v183_v46 }
  0xfe   : > { %v4826_v47 = vpop.f32.mrb[0].mxu0 }
  0xff   : > { %v356_v48 = vpop.f32.mrb[1].mxu0 }
 0x100   : > { %4876 = vmatprep.mubr.msk.f32.mxu1 %vm519_vm1, %v356_v48 }
 0x101   : > { %4877 = vmatmul.mubr.msk.f32.vlgmr.msra.gmra.mrb[0].mxu1 %vm519_vm1, %v4826_v47 }
 0x102   : > { %v4829_v49 = vpop.f32.mrb[2].mxu0 }
 0x103   : > { %v366_v50 = vpop.f32.mrb[3].mxu0 }
 0x104   : > { %4879 = vmatprep.mubr.msk.f32.mxu1 %vm519_vm1, %v366_v50 }
 0x105   : > { %4880 = vmatmul.mubr.msk.f32.gmra.mrb[2].mxu1 %vm519_vm1, %v4829_v49 }
 0x106   : > { %v4832_v51 = vpop.f32.mrb[4].mxu0 }
 0x107   : > { %v376_v52 = vpop.f32.mrb[5].mxu0 }
 0x108   : > { %4882 = vmatprep.mubr.msk.f32.mxu1 %vm519_vm1, %v376_v52 }
 0x109   : > { %4883 = vmatmul.mubr.msk.f32.gmra.mrb[4].mxu1 %vm519_vm1, %v4832_v51 }
 0x10a   : > { %v4835_v53 = vpop.f32.mrb[6].mxu0 }
 0x10b   : > { %v386_v54 = vpop.f32.mrb[7].mxu0 }
 0x10c   : > { %4885 = vmatprep.mubr.msk.f32.mxu1 %vm519_vm1, %v386_v54 }
 0x10d   : > { %4886 = vmatmul.mubr.msk.f32.gmra.mrb[6].mxu1 %vm519_vm1, %v4835_v53 }
 0x10e   : > { %v4838_v55 = vpop.f32.mrb[8].mxu0 }
 0x10f   : > { %v396_v56 = vpop.f32.mrb[9].mxu0 }
 0x110   : > { %4888 = vmatprep.mubr.msk.f32.mxu1 %vm519_vm1, %v396_v56 }
 0x111   : > { %4889 = vmatmul.mubr.msk.f32.gmra.mrb[8].mxu1 %vm519_vm1, %v4838_v55 }
 0x112   : > { %v4841_v57 = vpop.f32.mrb[10].mxu0 }
 0x113   : > { %v406_v58 = vpop.f32.mrb[11].mxu0 }
 0x114   : > { %4891 = vmatprep.mubr.msk.f32.mxu1 %vm519_vm1, %v406_v58 }
 0x115   : > { %4892 = vmatmul.mubr.msk.f32.gmra.mrb[10].mxu1 %vm519_vm1, %v4841_v57 }
 0x116   : > { %v4844_v60 = vpop.f32.mrb[12].mxu0 }
 0x117   : > { %v416_v62 = vpop.f32.mrb[13].mxu0 }
 0x118   : > { %4894 = vmatprep.mubr.msk.f32.mxu1 %vm519_vm1, %v416_v62 }
 0x119   : > { %4895 = vmatmul.mubr.msk.f32.gmra.mrb[12].mxu1 %vm519_vm1, %v4844_v60 }
 0x11a   : > { %v4847_v63 = vpop.f32.mrb[14].mxu0 }
 0x11b   : > { %v426_v0 = vpop.f32.mrb[15].mxu0 }
 0x11c   : > { %4897 = vmatprep.mubr.msk.f32.mxu1 %vm519_vm1, %v426_v0 }
 0x11d   : > { %4898 = vmatmul.mubr.msk.f32.gmra.mrb[14].mxu1 %vm519_vm1, %v4847_v63 }
 0x11e   : > { %v4850_v3 = vpop.f32.mrb[16].mxu0 }
 0x11f   : > { %v436_v7 = vpop.f32.mrb[17].mxu0 }
 0x120   : > { %4900 = vmatprep.mubr.msk.f32.mxu1 %vm519_vm1, %v436_v7 }
 0x121   : > { %4901 = vmatmul.mubr.msk.f32.gmra.mrb[16].mxu1 %vm519_vm1, %v4850_v3 }
 0x122   : > { %v4853_v9 = vpop.f32.mrb[18].mxu0 }
 0x123   : > { %v446_v10 = vpop.f32.mrb[19].mxu0 }
 0x124   : > { %4903 = vmatprep.mubr.msk.f32.mxu1 %vm519_vm1, %v446_v10 }
 0x125   : > { %4904 = vmatmul.mubr.msk.f32.gmra.mrb[18].mxu1 %vm519_vm1, %v4853_v9 }
 0x126   : > { %v4856_v12 = vpop.f32.mrb[20].mxu0 }
 0x127   : > { %v456_v13 = vpop.f32.mrb[21].mxu0 }
 0x128   : > { %4906 = vmatprep.mubr.msk.f32.mxu1 %vm519_vm1, %v456_v13 }
 0x129   : > { %4907 = vmatmul.mubr.msk.f32.gmra.mrb[20].mxu1 %vm519_vm1, %v4856_v12 }
 0x12a   : > { %v4859_v14 = vpop.f32.mrb[22].mxu0 }
 0x12b   : > { %v466_v15 = vpop.f32.mrb[23].mxu0 }
 0x12c   : > { %4909 = vmatprep.mubr.msk.f32.mxu1 %vm519_vm1, %v466_v15 }
 0x12d   : > { %4910 = vmatmul.mubr.msk.f32.gmra.mrb[22].mxu1 %vm519_vm1, %v4859_v14 }
 0x12e   : > { %v4862_v16 = vpop.f32.mrb[24].mxu0 }
 0x12f   : > { %v476_v17 = vpop.f32.mrb[25].mxu0 }
 0x130   : > { %4912 = vmatprep.mubr.msk.f32.mxu1 %vm519_vm1, %v476_v17 }
 0x131   : > { %4913 = vmatmul.mubr.msk.f32.gmra.mrb[24].mxu1 %vm519_vm1, %v4862_v16 }
 0x132   : > { %v4865_v18 = vpop.f32.mrb[26].mxu0 }
 0x133   : > { %v486_v19 = vpop.f32.mrb[27].mxu0 }
 0x134   : > { %4915 = vmatprep.mubr.msk.f32.mxu1 %vm519_vm1, %v486_v19 }
 0x135   : > { %4916 = vmatmul.mubr.msk.f32.gmra.mrb[26].mxu1 %vm519_vm1, %v4865_v18 }
 0x136   : > { %v4868_v20 = vpop.f32.mrb[28].mxu0 }
 0x137   : > { %v496_v21 = vpop.f32.mrb[29].mxu0 }
 0x138   : > { %4918 = vmatprep.mubr.msk.f32.mxu1 %vm519_vm1, %v496_v21 }
 0x139   : > { %4919 = vmatmul.mubr.msk.f32.gmra.mrb[28].mxu1 %vm519_vm1, %v4868_v20 }
 0x13a   : > { %v4871_v22 = vpop.f32.mrb[30].mxu0 }
 0x13b   : > { %v506_v23 = vpop.f32.mrb[31].mxu0 }
 0x13c   : > { %4921 = vmatprep.mubr.msk.f32.mxu1 %vm519_vm1, %v506_v23 }
 0x13d   : > { %4922 = vmatmul.mubr.msk.f32.gmra.mrb[30].mxu1 %vm519_vm1, %v4871_v22 }
 0x1d4   : > { %v4878_v59 = vpop.f32.mrb[0].mxu1 }
 0x1d5   : > { %v682_v61 = vpop.f32.mrb[1].mxu1  ;;  %v688_v25 = vadd.f32 %v4878_v59, %v6005_v1 }
 0x1d6   : > { %v683_v24 = vadd.f32 %v6005_v1, %v682_v61 }
 0x1d8   : > { %v4881_v2 = vpop.f32.mrb[2].mxu1 }
 0x1d9   : > { %v698_v5 = vadd.f32 %v4881_v2, %v6005_v1  ;;  %v692_v6 = vpop.f32.mrb[3].mxu1 }
 0x1da   : > { %v6010_v8 = vadd.f32 %v6005_v1, %v692_v6 }
 0x1dc   : > { %v5521_v11 = vpack.i.bf16 %v698_v5, %v6010_v8  ;;  %v6037_v33 = vpop.f32.mrb[4].mxu1 }
 0x1dd   : > { %v6039_v35 = vpop.f32.mrb[5].mxu1 }
 0x1de   : > { %5522 = vrot.lane.b32.xlu0 %v5521_v11, %s5763_s23 }
 0x1e0   : > { %v6042_v36 = vpop.f32.mrb[6].mxu1 }
 0x1e1   : > { %v6044_v37 = vpop.f32.mrb[7].mxu1 }
 0x1e4   : > { %v6046_v38 = vpop.f32.mrb[8].mxu1 }
 0x1e5   : > { %v6048_v39 = vpop.f32.mrb[9].mxu1 }
 0x1e8   : > { %v6050_v40 = vpop.f32.mrb[10].mxu1 }
 0x1e9   : > { %v6052_v41 = vpop.f32.mrb[11].mxu1 }
 0x1ec   : > { %v6054_v42 = vpop.f32.mrb[12].mxu1 }
 0x1ed   : > { %v6056_v43 = vpop.f32.mrb[13].mxu1 }
 0x1f0   : > { %v6058_v44 = vpop.f32.mrb[14].mxu1 }
 0x1f1   : > { %v6060_v45 = vpop.f32.mrb[15].mxu1 }
 0x1f4   : > { %v6062_v46 = vpop.f32.mrb[16].mxu1 }
 0x1f5   : > { %v6064_v47 = vpop.f32.mrb[17].mxu1 }
 0x1f8   : > { %v6066_v48 = vpop.f32.mrb[18].mxu1 }
 0x1f9   : > { %v6068_v49 = vpop.f32.mrb[19].mxu1 }
 0x1fc   : > { %841 = vxpose.xlu0.b32.start [1/2] (short) (narrow) %v683_v24, 32  ;;  %v6070_v50 = vpop.f32.mrb[20].mxu1 }
 0x1fd   : > { %v6072_v51 = vpop.f32.mrb[21].mxu1 }
 0x200   : > { %842 = vxpose.xlu0.b32.end [2/2] (short) (narrow) %v688_v25, 32  ;;  %v6074_v52 = vpop.f32.mrb[22].mxu1 }
 0x201   : > { %v6076_v53 = vpop.f32.mrb[23].mxu1 }
 0x204   : > { %v6078_v54 = vpop.f32.mrb[24].mxu1 }
 0x205   : > { %v6080_v55 = vpop.f32.mrb[25].mxu1 }
 0x208   : > { %v6082_v56 = vpop.f32.mrb[26].mxu1 }
 0x209   : > { %v6084_v57 = vpop.f32.mrb[27].mxu1 }
 0x20c   : > { %v6086_v58 = vpop.f32.mrb[28].mxu1 }
 0x20d   : > { %v6088_v59 = vpop.f32.mrb[29].mxu1 }
 0x210   : > { %v6090_v60 = vpop.f32.mrb[30].mxu1 }
 0x211   : > { %v6092_v61 = vpop.f32.mrb[31].mxu1 }
 0x231   : > { %1025 = vrot.lane.b32.xlu0 %v698_v5, %s5764_s24 }
 0x250   : > { %v5523_v26 = vpop.permute.xlu0 %5522 }
 0x251   : > { %v5525_v27 = vunpack.i.h.bf16 %v5523_v26  ;;  %v5524_v28 = vunpack.i.l.bf16 %v5523_v26 }
 0x253   : > { %v5256_v29 = vpack.c.bf16 %v5525_v27, %v5524_v28 }
 0x255   : > { %5257 = vmatprep.subr.bf16.mxu1 %v5256_v29 }
 0x256   : > { %5259 = vmatpush3.bf16.msra.mxu1 %v5256_v29  ;;  %v6104_v29 = vadd.f32 %v6042_v36, %v6005_v1  ;;  %v187_v36 = vld [vmem:[%s6628_s1 + $0x118] sm:$0xff] }
 0x27c   : > { %v857_v30 = vpop.trf.xlu0 }
 0x27d   : > { %4928 = vmatprep.mubr.msk.f32.mxu1 %vm519_vm1, %v857_v30  ;;  %v6108_v30 = vadd.f32 %v6005_v1, %v6044_v37  ;;  %v189_v37 = vld [vmem:[%s6628_s1 + $0x128] sm:$0xff] }
 0x280   : > { %v858_v31 = vpop.trf.xlu0 }
 0x281   : > { %4929 = vmatmul.mubr.msk.f32.vlgmr.msra.gmra.mrb[32].mxu1 %vm519_vm1, %v858_v31  ;;  %v5526_v31 = vpack.i.bf16 %v6104_v29, %v6108_v30 }
 0x284   : > { %v859_v32 = vpop.trf.xlu0 }
 0x285   : > { %4931 = vmatprep.mubr.msk.f32.mxu1 %vm519_vm1, %v859_v32  ;;  %v703_v32 = vadd.f32 %v6005_v1, %v6039_v35  ;;  %v190_v35 = vld [vmem:[%s6628_s1 + $0x130] sm:$0xff] }
 0x288   : > { %v860_v34 = vpop.trf.xlu0 }
 0x289   : > { %4932 = vmatmul.mubr.msk.f32.gmra.mrb[34].mxu1 %vm519_vm1, %v860_v34  ;;  %v708_v34 = vadd.f32 %v6037_v33, %v6005_v1  ;;  %v6133_v33 = vpack.c.bf16 %v190_v35, %v189_v37 }
 0x354   : > { %v4930_v62 = vpop.f32.mrb[32].mxu1 }
 0x355   : > { %v982_v63 = vsel %vm978_vm2, %v4930_v62, -inf  ;;  %v959_v0 = vpop.f32.mrb[33].mxu1 }
 0x356   : > { %983 = vmax.xlane.f32.xlu1 %v982_v63  ;;  %v979_v2 = vsel %vm978_vm2, %v959_v0, -inf }
 0x35a   : > { %980 = vmax.xlane.f32.xlu1 %v979_v2 }
 0x35c   : > { %v4933_v3 = vpop.f32.mrb[34].mxu1 }
 0x35d   : > { %v969_v5 = vpop.f32.mrb[35].mxu1  ;;  %v988_v7 = vsel %vm978_vm2, %v4933_v3, -inf }
 0x35e   : > { %v985_v6 = vsel %vm978_vm2, %v969_v5, -inf }
 0x35f   : > { %986 = vmax.xlane.f32.xlu1 %v985_v6 }
 0x363   : > { %989 = vmax.xlane.f32.xlu1 %v988_v7 }
 0x3e3   : > { %v984_v9 = vpop.xlane.xlu1 %983 }
 0x3e4   : > { %v992_v10 = vsub.f32 %v4930_v62, %v984_v9 }
 0x3e6   : > { %v997_v11 = vmul.f32 1.442695, %v992_v10 }
 0x3e7   : > { %v981_v12 = vpop.xlane.xlu1 %980 }
 0x3e8   : > { %5561 = vpow2.f32 %v997_v11  ;;  %v991_v13 = vsub.f32 %v959_v0, %v981_v12 }
 0x3ea   : > { %v995_v14 = vmul.f32 1.442695, %v991_v13 }
 0x3ec   : > { %5563 = vpow2.f32 %v995_v14  ;;  %v987_v15 = vpop.xlane.xlu1 %986 }
 0x3ed   : > { %v993_v16 = vsub.f32 %v969_v5, %v987_v15 }
 0x3ef   : > { %v999_v20 = vmul.f32 1.442695, %v993_v16 }
 0x3f0   : > { %v990_v17 = vpop.xlane.xlu1 %989 }
 0x3f1   : > { %v994_v18 = vsub.f32 %v4933_v3, %v990_v17 }
 0x3f2   : > { %v5562_v19 = vpop.eup %5561 }
 0x3f3   : > { %v1001_v21 = vmul.f32 1.442695, %v994_v18  ;;  %v1006_v22 = vsel %vm978_vm2, %v5562_v19, 0.0 }
 0x3f4   : > { %1007 = vadd.xlane.f32.xlu1 %v1006_v22  ;;  %v1026_v22 = vpop.permute.xlu0 %1025 }
 0x3f5   : > { %5565 = vpow2.f32 %v1001_v21 }
 0x3f6   : > { %v5564_v23 = vpop.eup %5563  ;;  %5567 = vpow2.f32 %v999_v20 }
 0x3f7   : > { %v1003_v24 = vsel %vm978_vm2, %v5564_v23, 0.0 }
 0x3f8   : > { %1004 = vadd.xlane.f32.xlu1 %v1003_v24 }
 0x3ff   : > { %v5566_v25 = vpop.eup %5565 }
 0x400   : > { %v1012_v26 = vsel %vm978_vm2, %v5566_v25, 0.0  ;;  %v5568_v27 = vpop.eup %5567 }
 0x401   : > { %1013 = vadd.xlane.f32.xlu1 %v1012_v26  ;;  %v1009_v28 = vsel %vm978_vm2, %v5568_v27, 0.0 }
 0x405   : > { %1010 = vadd.xlane.f32.xlu1 %v1009_v28 }
 0x416   : > { %1023 = vrot.lane.b32.xlu1 %v6010_v8, %s5764_s24  ;;  %v188_v8 = vld [vmem:[%s6628_s1 + $0x120] sm:$0xff] }
 0x417   : > { %v6128_v62 = vpack.c.bf16 %v188_v8, %v187_v36 }
 0x419   : > { %5273 = vmatprep.subr.bf16.mxu1 %v6128_v62 }
 0x41a   : > { %5527 = vrot.lane.b32.xlu1 %v5526_v31, %s5763_s23  ;;  %5275 = vmatpush3.bf16.msra.mxu1 %v6128_v62 }
 0x41b   : > { %5277 = vmatprep.subr.bf16.mxu1 %v6133_v33 }
 0x41e   : > { %5279 = vmatpush3.bf16.msra.mxu1 %v6133_v33 }
 0x443   : > { %1275 = vxpose.xlu1.b32.start [1/2] (short) (narrow) %v703_v32, 32 }
 0x447   : > { %1276 = vxpose.xlu1.b32.end [2/2] (short) (narrow) %v708_v34, 32 }
 0x481   : > { %v1008_v63 = vpop.xlane.xlu1 %1007 }
 0x482   : > { %5569 = vrcp.f32 %v1008_v63 }
 0x485   : > { %v1005_v0 = vpop.xlane.xlu1 %1004 }
 0x486   : > { %5571 = vrcp.f32 %v1005_v0  ;;  %v6171_v0 = vadd.f32 %v6050_v40, %v6005_v1 }
 0x48c   : > { %v5570_v2 = vpop.eup %5569 }
 0x48d   : > { %v1020_v7 = vmul.f32 %v5570_v2, %v5562_v19  ;;  %v6175_v2 = vadd.f32 %v6005_v1, %v6052_v41 }
 0x48e   : > { %v1014_v3 = vpop.xlane.xlu1 %1013 }
 0x48f   : > { %5573 = vrcp.f32 %v1014_v3  ;;  %v5531_v3 = vpack.i.bf16 %v6171_v0, %v6175_v2 }
 0x490   : > { %v5572_v5 = vpop.eup %5571 }
 0x491   : > { %v1019_v6 = vmul.f32 %v5572_v5, %v5564_v23  ;;  %v5765_v5 = vmov 0.0|0.0  }
 0x492   : > { %v1011_v9 = vpop.xlane.xlu1 %1010  ;;  %5280 = vmatprep.subr.bf16.mxu1 %v5765_v5 }
 0x493   : > { %5575 = vrcp.f32 %v1011_v9  ;;  %v5260_v11 = vpack.c.bf16 %v1020_v7, %v1019_v6 }
 0x495   : > { %5262 = vmatprep.subr.msk.bf16.mxu0 %vm6141_vm3, %v5260_v11 }
 0x496   : > { %5265 = vmatpush3.bf16.xpose.msk.msra.mxu0 %vm6141_vm3, %v5260_v11  ;;  %v1024_v12 = vpop.permute.xlu1 %1023 }
 0x497   : > { %4942 = vmatprep.mubr.msk.f32.mxu0 %vm978_vm2, %v1024_v12 }
 0x499   : > { %v5574_v13 = vpop.eup %5573 }
 0x49a   : > { %v5528_v14 = vpop.permute.xlu1 %5527  ;;  %v1022_v19 = vmul.f32 %v5574_v13, %v5566_v25 }
 0x49b   : > { %v5530_v16 = vunpack.i.h.bf16 %v5528_v14  ;;  %v5529_v17 = vunpack.i.l.bf16 %v5528_v14 }
 0x49d   : > { %v5576_v15 = vpop.eup %5575  ;;  %v5283_v21 = vpack.c.bf16 %v5530_v16, %v5529_v17 }
 0x49e   : > { %v1021_v18 = vmul.f32 %v5576_v15, %v5568_v27 }
 0x4a0   : > { %v5266_v20 = vpack.c.bf16 %v1022_v19, %v1021_v18 }
 0x4a2   : > { %5268 = vmatprep.subr.msk.bf16.mxu0 %vm6141_vm3, %v5266_v20 }
 0x4a3   : > { %5271 = vmatpush3.bf16.xpose.msk.msra.mxu0 %vm6141_vm3, %v5266_v20 }
 0x4a4   : > { %5284 = vmatprep.subr.bf16.mxu0 %v5283_v21 }
 0x4aa   : > { %4943 = vmatmul.mubr.msk.f32.vlgmr.msra.gmra.mrb[32].mxu0 %vm978_vm2, %v1026_v22 }
 0x4ab   : > { %5286 = vmatpush3.bf16.msra.mxu0 %v5283_v21 }
 0x4ac   : > { %5300 = vmatprep.subr.bf16.mxu0 %v6128_v62 }
 0x4c3   : > { %v1291_v23 = vpop.trf.xlu1 }
 0x4c4   : > { %4967 = vmatprep.mubr.msk.f32.mxu0 %vm519_vm1, %v1291_v23 }
 0x4c7   : > { %v1292_v24 = vpop.trf.xlu1 }
 0x4c8   : > { %4968 = vmatmul.mubr.msk.f32.vlgmr.msra.gmra.mrb[34].mxu0 %vm519_vm1, %v1292_v24 }
 0x4c9   : > { %5302 = vmatpush3.bf16.msra.mxu0 %v6128_v62 }
 0x4ca   : > { %5304 = vmatprep.subr.bf16.mxu0 %v6133_v33 }
 0x4cb   : > { %v1293_v25 = vpop.trf.xlu1 }
 0x4cc   : > { %4970 = vmatprep.mubr.msk.f32.mxu0 %vm519_vm1, %v1293_v25 }
 0x4cd   : > { %5306 = vmatpush3.bf16.msra.mxu0 %v6133_v33 }
 0x4ce   : > { %5307 = vmatprep.subr.bf16.mxu0 %v5765_v5 }
 0x4cf   : > { %v1294_v26 = vpop.trf.xlu1 }
 0x4d0   : > { %4971 = vmatmul.mubr.msk.f32.gmra.mrb[36].mxu0 %vm519_vm1, %v1294_v26 }
 0x57d   : > { %v4944_v27 = vpop.f32.mrb[32].mxu0 }
 0x57e   : > { %v1109_v28 = vpop.f32.mrb[33].mxu0 }
 0x57f   : > { %4953 = vmatprep.mubr.msk.f32.mxu1 %vm978_vm2, %v1109_v28  ;;  %v5767_v28 = vmov 0.0  }
 0x580   : > { %4954 = vmatmul.mubr.msk.f32.vlgmr.msra.gmra.mrb[36].mxu1 %vm978_vm2, %v4944_v27 }
 0x581   : > { %4960 = vmatprep.mubr.msk.f32.mxu1 %vm5766_vm4, %v5767_v28 }
 0x59b   : > { %v4969_v31 = vpop.f32.mrb[34].mxu0 }
 0x59c   : > { %v1393_v32 = vpop.f32.mrb[35].mxu0  ;;  %v1415_v34 = vsel %vm978_vm2, %v4969_v31, -inf }
 0x59d   : > { %1416 = vmax.xlane.f32.xlu1 %v1415_v34  ;;  %v1412_v36 = vsel %vm978_vm2, %v1393_v32, -inf  ;;  %v728_v34 = vadd.f32 %v6046_v38, %v6005_v1 }
 0x59e   : > { %1413 = vmax.xlane.f32.xlu0 %v1412_v36 }
 0x5a3   : > { %v4972_v8 = vpop.f32.mrb[36].mxu0 }
 0x5a4   : > { %v1403_v37 = vpop.f32.mrb[37].mxu0  ;;  %v1421_v63 = vsel %vm978_vm2, %v4972_v8, -inf }
 0x5a5   : > { %v1418_v35 = vsel %vm978_vm2, %v1403_v37, -inf }
 0x5a6   : > { %1419 = vmax.xlane.f32.xlu0 %v1418_v35 }
 0x5aa   : > { %1422 = vmax.xlane.f32.xlu0 %v1421_v63 }
 0x5ae   : > { %1458 = vrot.lane.b32.xlu1 %v6104_v29, %s5764_s24 }
 0x5b2   : > { %5532 = vrot.lane.b32.xlu1 %v5531_v3, %s5763_s23 }
 0x62a   : > { %v1417_v6 = vpop.xlane.xlu1 %1416 }
 0x62b   : > { %v1425_v40 = vsub.f32 %v4969_v31, %v1417_v6  ;;  %v1414_v7 = vpop.xlane.xlu0 %1413  ;;  %v6193_v31 = vld [vmem:[%s6628_s1 + $0x138] sm:$0x7] }
 0x62c   : > { %v1424_v9 = vsub.f32 %v1393_v32, %v1414_v7  ;;  %v723_v32 = vadd.f32 %v6005_v1, %v6048_v39 }
 0x62d   : > { %v1430_v11 = vmul.f32 1.442695, %v1425_v40 }
 0x62e   : > { %v1428_v41 = vmul.f32 1.442695, %v1424_v9 }
 0x62f   : > { %5577 = vpow2.f32 %v1430_v11 }
 0x630   : > { %5579 = vpow2.f32 %v1428_v41 }
 0x633   : > { %v1420_v12 = vpop.xlane.xlu0 %1419 }
 0x634   : > { %v1426_v29 = vsub.f32 %v1403_v37, %v1420_v12  ;;  %v1459_v12 = vpop.permute.xlu1 %1458 }
 0x636   : > { %v1432_v13 = vmul.f32 1.442695, %v1426_v29  ;;  %v192_v29 = vld [vmem:[%s6628_s1 + $0x140] sm:$0x7] }
 0x637   : > { %v1423_v14 = vpop.xlane.xlu0 %1422 }
 0x638   : > { %5581 = vpow2.f32 %v1432_v13  ;;  %v1427_v15 = vsub.f32 %v4972_v8, %v1423_v14 }
 0x639   : > { %v5578_v16 = vpop.eup %5577 }
 0x63a   : > { %v1434_v17 = vmul.f32 1.442695, %v1427_v15  ;;  %v1439_v18 = vsel %vm978_vm2, %v5578_v16, 0.0  ;;  %v5580_v19 = vpop.eup %5579 }
 0x63b   : > { %1440 = vadd.xlane.f32.xlu0 %v1439_v18  ;;  %v1436_v20 = vsel %vm978_vm2, %v5580_v19, 0.0 }
 0x63c   : > { %5583 = vpow2.f32 %v1434_v17 }
 0x63f   : > { %1437 = vadd.xlane.f32.xlu0 %v1436_v20  ;;  %v5533_v20 = vpop.permute.xlu1 %5532 }
 0x642   : > { %v5582_v21 = vpop.eup %5581 }
 0x643   : > { %v1442_v22 = vsel %vm978_vm2, %v5582_v21, 0.0 }
 0x644   : > { %1443 = vadd.xlane.f32.xlu0 %v1442_v22  ;;  %v5534_v22 = vunpack.i.l.bf16 %v5533_v20 }
 0x646   : > { %v5584_v23 = vpop.eup %5583 }
 0x647   : > { %v1445_v24 = vsel %vm978_vm2, %v5584_v23, 0.0 }
 0x648   : > { %1446 = vadd.xlane.f32.xlu0 %v1445_v24 }
 0x653   : > { %v4955_v25 = vpop.f32.mrb[36].mxu1 }
 0x654   : > { %v1190_v26 = vpop.f32.mrb[37].mxu1 }
 0x655   : > { %v5281_v27 = vpack.c.bf16 %v4955_v25, %v1190_v26 }
 0x657   : > { %5282 = vmatpush3.bf16.msra.mxu1 %v5281_v27 }
 0x65a   : > { %4961 = vmatmul.mubr.msk.f32.vlgmr.msra.gmra.mrb[38].mxu1 %vm519_vm1, %v6193_v31 }
 0x65e   : > { %1456 = vrot.lane.b32.xlu0 %v6108_v30, %s5764_s24 }
 0x67c   : > { %1709 = vxpose.xlu0.b32.start [1/2] (short) (narrow) %v723_v32, 32 }
 0x680   : > { %1710 = vxpose.xlu0.b32.end [2/2] (short) (narrow) %v728_v34, 32 }
 0x6c8   : > { %v1441_v36 = vpop.xlane.xlu0 %1440 }
 0x6c9   : > { %5585 = vrcp.f32 %v1441_v36 }
 0x6cc   : > { %v1438_v8 = vpop.xlane.xlu0 %1437 }
 0x6cd   : > { %5587 = vrcp.f32 %v1438_v8 }
 0x6d1   : > { %v1444_v37 = vpop.xlane.xlu0 %1443 }
 0x6d2   : > { %5589 = vrcp.f32 %v1444_v37 }
 0x6d3   : > { %v5586_v35 = vpop.eup %5585 }
 0x6d4   : > { %v1453_v30 = vmul.f32 %v5586_v35, %v5578_v16 }
 0x6d5   : > { %v1447_v63 = vpop.xlane.xlu0 %1446 }
 0x6d6   : > { %5591 = vrcp.f32 %v1447_v63 }
 0x6d7   : > { %v5588_v3 = vpop.eup %5587 }
 0x6d8   : > { %v1452_v6 = vmul.f32 %v5588_v3, %v5580_v19 }
 0x6d9   : > { %v1457_v40 = vpop.permute.xlu0 %1456 }
 0x6da   : > { %4981 = vmatprep.mubr.msk.f32.mxu1 %vm978_vm2, %v1457_v40  ;;  %v5287_v39 = vpack.c.bf16 %v1453_v30, %v1452_v6 }
 0x6dc   : > { %5289 = vmatprep.subr.msk.bf16.mxu1 %vm6141_vm3, %v5287_v39  ;;  %v5590_v38 = vpop.eup %5589 }
 0x6dd   : > { %5292 = vmatpush3.bf16.xpose.msk.msra.mxu1 %vm6141_vm3, %v5287_v39  ;;  %v1454_v9 = vmul.f32 %v5590_v38, %v5582_v21  ;;  %v5535_v21 = vunpack.i.h.bf16 %v5533_v20  ;;  %v743_v39 = vadd.f32 %v6005_v1, %v6056_v43  ;;  %v748_v38 = vadd.f32 %v6054_v42, %v6005_v1 }
 0x6df   : > { %v5310_v26 = vpack.c.bf16 %v5535_v21, %v5534_v22 }
 0x6e0   : > { %v5592_v7 = vpop.eup %5591 }
 0x6e1   : > { %v1455_v11 = vmul.f32 %v5592_v7, %v5584_v23 }
 0x6e3   : > { %v5293_v41 = vpack.c.bf16 %v1455_v11, %v1454_v9 }
 0x6e5   : > { %5295 = vmatprep.subr.msk.bf16.mxu1 %vm6141_vm3, %v5293_v41 }
 0x6e6   : > { %5298 = vmatpush3.bf16.xpose.msk.msra.mxu1 %vm6141_vm3, %v5293_v41 }
 0x6ed   : > { %4982 = vmatmul.mubr.msk.f32.vlgmr.msra.gmra.mrb[40].mxu1 %vm978_vm2, %v1459_v12 }
 0x6fc   : > { %v1725_v19 = vpop.trf.xlu0 }
 0x700   : > { %v1726_v24 = vpop.trf.xlu0 }
 0x704   : > { %v1727_v27 = vpop.trf.xlu0 }
 0x708   : > { %v1728_v32 = vpop.trf.xlu0 }
 0x72d   : > { %v1268_v13 = vpop.f32.mrb[38].mxu1 }
 0x72e   : > { %v1269_v14 = vadd.f32 %v1268_v13, %v192_v29  ;;  %v4962_v15 = vpop.f32.mrb[39].mxu1 }
 0x730   : > { %v1272_v16 = vadd.f32 %v1269_v14, %v5854_v4 }
 0x732   : > { %1274 = vst.msk [vmem:[%s6220_s21] sm:$0x7] %vm1273_vm5, %v1272_v16 }
 0x7c0   : > { %v4983_v17 = vpop.f32.mrb[40].mxu1 }
 0x7c1   : > { %v1542_v18 = vpop.f32.mrb[41].mxu1 }
 0x7c2   : > { %4992 = vmatprep.mubr.msk.f32.mxu0 %vm978_vm2, %v1542_v18 }
 0x7c3   : > { %4993 = vmatmul.mubr.msk.f32.vlgmr.msra.gmra.mrb[38].mxu0 %vm978_vm2, %v4983_v17 }
 0x7c4   : > { %4999 = vmatprep.mubr.msk.f32.mxu0 %vm5766_vm4, %v5767_v28 }
 0x896   : > { %v4994_v23 = vpop.f32.mrb[38].mxu0 }
 0x897   : > { %v1623_v4 = vpop.f32.mrb[39].mxu0 }
 0x898   : > { %v5308_v25 = vpack.c.bf16 %v4994_v23, %v1623_v4  ;;  %v6256_v4 = vadd.f32 %v6058_v44, %v6005_v1 }
 0x89a   : > { %5309 = vmatpush3.bf16.msra.mxu0 %v5308_v25  ;;  %v6260_v25 = vadd.f32 %v6005_v1, %v6060_v45 }
 0x89b   : > { %5311 = vmatprep.subr.bf16.mxu0 %v5310_v26 }
 0x89d   : > { %5000 = vmatmul.mubr.msk.f32.vlgmr.msra.gmra.mrb[40].mxu0 %vm519_vm1, %v6193_v31 }
 0x89e   : > { %5313 = vmatpush3.bf16.msra.mxu0 %v5310_v26  ;;  %5006 = vmatprep.mubr.msk.f32.mxu0 %vm519_vm1, %v1725_v19  ;;  %v5536_v26 = vpack.i.bf16 %v6256_v4, %v6260_v25 }
 0x89f   : > { %5327 = vmatprep.subr.bf16.mxu0 %v6128_v62 }
 0x8a1   : > { %5007 = vmatmul.mubr.msk.f32.vlgmr.msra.gmra.mrb[42].mxu0 %vm519_vm1, %v1726_v24 }
 0x8a2   : > { %5009 = vmatprep.mubr.msk.f32.mxu0 %vm519_vm1, %v1727_v27  ;;  %5329 = vmatpush3.bf16.msra.mxu0 %v6128_v62 }
 0x8a3   : > { %5331 = vmatprep.subr.bf16.mxu0 %v6133_v33 }
 0x8a5   : > { %5010 = vmatmul.mubr.msk.f32.gmra.mrb[44].mxu0 %vm519_vm1, %v1728_v32 }
 0x8a6   : > { %5333 = vmatpush3.bf16.msra.mxu0 %v6133_v33 }
 0x8a7   : > { %5334 = vmatprep.subr.bf16.mxu0 %v5765_v5 }
 0x970   : > { %v6238_v34 = vpop.f32.mrb[40].mxu0 }
 0x971   : > { %v5001_v36 = vpop.f32.mrb[41].mxu0 }
 0x974   : > { %v5008_v8 = vpop.f32.mrb[42].mxu0 }
 0x975   : > { %v1827_v37 = vpop.f32.mrb[43].mxu0  ;;  %v1849_v35 = vsel %vm978_vm2, %v5008_v8, -inf }
 0x976   : > { %1850 = vmax.xlane.f32.xlu0 %v1849_v35  ;;  %v1846_v63 = vsel %vm978_vm2, %v1827_v37, -inf }
 0x977   : > { %1847 = vmax.xlane.f32.xlu1 %v1846_v63 }
 0x978   : > { %v5011_v3 = vpop.f32.mrb[44].mxu0 }
 0x979   : > { %v1837_v6 = vpop.f32.mrb[45].mxu0  ;;  %v1855_v40 = vsel %vm978_vm2, %v5011_v3, -inf }
 0x97a   : > { %v1852_v30 = vsel %vm978_vm2, %v1837_v6, -inf }
 0x97b   : > { %1853 = vmax.xlane.f32.xlu1 %v1852_v30 }
 0x97f   : > { %1856 = vmax.xlane.f32.xlu1 %v1855_v40 }
 0x9a3   : > { %2143 = vxpose.xlu0.b32.start [1/2] (short) (narrow) %v743_v39, 32 }
 0x9a7   : > { %2144 = vxpose.xlu0.b32.end [2/2] (short) (narrow) %v748_v38, 32 }
 0xa03   : > { %v1851_v7 = vpop.xlane.xlu0 %1850 }
 0xa04   : > { %v1859_v9 = vsub.f32 %v5008_v8, %v1851_v7  ;;  %v1848_v11 = vpop.xlane.xlu1 %1847 }
 0xa05   : > { %v1858_v41 = vsub.f32 %v1827_v37, %v1848_v11 }
 0xa06   : > { %v1864_v12 = vmul.f32 1.442695, %v1859_v9 }
 0xa07   : > { %v1862_v29 = vmul.f32 1.442695, %v1858_v41 }
 0xa08   : > { %5593 = vpow2.f32 %v1864_v12  ;;  %v1854_v13 = vpop.xlane.xlu1 %1853 }
 0xa09   : > { %5595 = vpow2.f32 %v1862_v29  ;;  %v1860_v14 = vsub.f32 %v1837_v6, %v1854_v13 }
 0xa0b   : > { %v1866_v17 = vmul.f32 1.442695, %v1860_v14 }
 0xa0c   : > { %v1857_v15 = vpop.xlane.xlu1 %1856 }
 0xa0d   : > { %v1861_v16 = vsub.f32 %v5011_v3, %v1857_v15 }
 0xa0f   : > { %v1868_v18 = vmul.f32 1.442695, %v1861_v16 }
 0xa11   : > { %5597 = vpow2.f32 %v1868_v18 }
 0xa12   : > { %v5594_v43 = vpop.eup %5593  ;;  %5599 = vpow2.f32 %v1866_v17 }
 0xa13   : > { %v1873_v42 = vsel %vm978_vm2, %v5594_v43, 0.0  ;;  %v5596_v19 = vpop.eup %5595 }
 0xa14   : > { %1874 = vadd.xlane.f32.xlu1 %v1873_v42  ;;  %v1870_v20 = vsel %vm978_vm2, %v5596_v19, 0.0 }
 0xa18   : > { %1871 = vadd.xlane.f32.xlu1 %v1870_v20 }
 0xa1b   : > { %v5598_v21 = vpop.eup %5597 }
 0xa1c   : > { %v1879_v22 = vsel %vm978_vm2, %v5598_v21, 0.0  ;;  %v5600_v23 = vpop.eup %5599 }
 0xa1d   : > { %1880 = vadd.xlane.f32.xlu1 %v1879_v22  ;;  %v1876_v24 = vsel %vm978_vm2, %v5600_v23, 0.0 }
 0xa21   : > { %1877 = vadd.xlane.f32.xlu1 %v1876_v24 }
 0xa23   : > { %v2159_v9 = vpop.trf.xlu0 }
 0xa27   : > { %v2160_v13 = vpop.trf.xlu0 }
 0xa2b   : > { %v2161_v17 = vpop.trf.xlu0 }
 0xa2f   : > { %v2162_v18 = vpop.trf.xlu0 }
 0xa32   : > { %1890 = vrot.lane.b32.xlu1 %v6175_v2, %s5764_s24 }
 0xa36   : > { %1892 = vrot.lane.b32.xlu1 %v6171_v0, %s5764_s24 }
 0xa3a   : > { %5537 = vrot.lane.b32.xlu1 %v5536_v26, %s5763_s23 }
 0xaa1   : > { %v1875_v27 = vpop.xlane.xlu1 %1874 }
 0xaa2   : > { %5601 = vrcp.f32 %v1875_v27 }
 0xaa5   : > { %v1872_v32 = vpop.xlane.xlu1 %1871 }
 0xaa6   : > { %5603 = vrcp.f32 %v1872_v32 }
 0xaaa   : > { %v1881_v2 = vpop.xlane.xlu1 %1880 }
 0xaab   : > { %5605 = vrcp.f32 %v1881_v2 }
 0xaac   : > { %v5602_v44 = vpop.eup %5601 }
 0xaad   : > { %v1887_v37 = vmul.f32 %v5602_v44, %v5594_v43 }
 0xaae   : > { %v1878_v36 = vpop.xlane.xlu1 %1877 }
 0xaaf   : > { %5607 = vrcp.f32 %v1878_v36 }
 0xab0   : > { %v5604_v8 = vpop.eup %5603 }
 0xab1   : > { %v1886_v45 = vmul.f32 %v5604_v8, %v5596_v19 }
 0xab2   : > { %v1891_v35 = vpop.permute.xlu1 %1890 }
 0xab3   : > { %5020 = vmatprep.mubr.msk.f32.mxu1 %vm978_vm2, %v1891_v35  ;;  %v5314_v0 = vpack.c.bf16 %v1887_v37, %v1886_v45 }
 0xab5   : > { %5316 = vmatprep.subr.msk.bf16.mxu1 %vm6141_vm3, %v5314_v0  ;;  %v5606_v63 = vpop.eup %5605 }
 0xab6   : > { %5319 = vmatpush3.bf16.xpose.msk.msra.mxu1 %vm6141_vm3, %v5314_v0  ;;  %v1889_v30 = vmul.f32 %v5606_v63, %v5598_v21  ;;  %v1893_v39 = vpop.permute.xlu1 %1892 }
 0xab9   : > { %v5608_v3 = vpop.eup %5607 }
 0xaba   : > { %v1888_v6 = vmul.f32 %v5608_v3, %v5600_v23  ;;  %v5538_v11 = vpop.permute.xlu1 %5537 }
 0xabb   : > { %v5540_v41 = vunpack.i.h.bf16 %v5538_v11  ;;  %v5539_v12 = vunpack.i.l.bf16 %v5538_v11 }
 0xabc   : > { %v5320_v40 = vpack.c.bf16 %v1889_v30, %v1888_v6 }
 0xabd   : > { %v5337_v16 = vpack.c.bf16 %v5540_v41, %v5539_v12  ;;  %v6306_v12 = vadd.f32 %v6066_v48, %v6005_v1 }
 0xabe   : > { %5322 = vmatprep.subr.msk.bf16.mxu1 %vm6141_vm3, %v5320_v40 }
 0xabf   : > { %5325 = vmatpush3.bf16.xpose.msk.msra.mxu1 %vm6141_vm3, %v5320_v40 }
 0xac6   : > { %5021 = vmatmul.mubr.msk.f32.vlgmr.msra.gmra.mrb[42].mxu1 %vm978_vm2, %v1893_v39 }
 0xb99   : > { %v5022_v38 = vpop.f32.mrb[42].mxu1 }
 0xb9a   : > { %v1976_v7 = vpop.f32.mrb[43].mxu1 }
 0xb9b   : > { %5031 = vmatprep.mubr.msk.f32.mxu0 %vm978_vm2, %v1976_v7 }
 0xb9c   : > { %5032 = vmatmul.mubr.msk.f32.vlgmr.msra.gmra.mrb[46].mxu0 %vm978_vm2, %v5022_v38 }
 0xb9d   : > { %5038 = vmatprep.mubr.msk.f32.mxu0 %vm5766_vm4, %v5767_v28 }
 0xc6f   : > { %v5033_v29 = vpop.f32.mrb[46].mxu0 }
 0xc70   : > { %v2057_v14 = vpop.f32.mrb[47].mxu0 }
 0xc71   : > { %v5335_v15 = vpack.c.bf16 %v5033_v29, %v2057_v14  ;;  %v773_v29 = vadd.f32 %v6005_v1, %v6068_v49  ;;  %v763_v14 = vadd.f32 %v6005_v1, %v6064_v47 }
 0xc73   : > { %5336 = vmatpush3.bf16.msra.mxu0 %v5335_v15 }
 0xc74   : > { %5338 = vmatprep.subr.bf16.mxu0 %v5337_v16 }
 0xc76   : > { %5039 = vmatmul.mubr.msk.f32.vlgmr.msra.gmra.mrb[48].mxu0 %vm519_vm1, %v6193_v31 }
 0xc77   : > { %5340 = vmatpush3.bf16.msra.mxu0 %v5337_v16  ;;  %5045 = vmatprep.mubr.msk.f32.mxu0 %vm519_vm1, %v2159_v9 }
 0xc78   : > { %5354 = vmatprep.subr.bf16.mxu0 %v6128_v62 }
 0xc7a   : > { %5046 = vmatmul.mubr.msk.f32.vlgmr.msra.gmra.mrb[50].mxu0 %vm519_vm1, %v2160_v13  ;;  %v5541_v13 = vpack.i.bf16 %v6306_v12, %v773_v29 }
 0xc7b   : > { %5048 = vmatprep.mubr.msk.f32.mxu0 %vm519_vm1, %v2161_v17  ;;  %5356 = vmatpush3.bf16.msra.mxu0 %v6128_v62 }
 0xc7c   : > { %5358 = vmatprep.subr.bf16.mxu0 %v6133_v33 }
 0xc7e   : > { %5049 = vmatmul.mubr.msk.f32.gmra.mrb[52].mxu0 %vm519_vm1, %v2162_v18 }
 0xc7f   : > { %5360 = vmatpush3.bf16.msra.mxu0 %v6133_v33 }
 0xc80   : > { %5361 = vmatprep.subr.bf16.mxu0 %v5765_v5 }
 0xd49   : > { %v6292_v43 = vpop.f32.mrb[48].mxu0 }
 0xd4a   : > { %v5040_v42 = vpop.f32.mrb[49].mxu0 }
 0xd4d   : > { %v5047_v19 = vpop.f32.mrb[50].mxu0 }
 0xd4e   : > { %v2283_v20 = vsel %vm978_vm2, %v5047_v19, -inf  ;;  %v2261_v21 = vpop.f32.mrb[51].mxu0 }
 0xd4f   : > { %2284 = vmax.xlane.f32.xlu1 %v2283_v20  ;;  %v2280_v23 = vsel %vm978_vm2, %v2261_v21, -inf }
 0xd51   : > { %v5050_v22 = vpop.f32.mrb[52].mxu0 }
 0xd52   : > { %v2271_v24 = vpop.f32.mrb[53].mxu0  ;;  %v2289_v27 = vsel %vm978_vm2, %v5050_v22, -inf }
 0xd53   : > { %2281 = vmax.xlane.f32.xlu1 %v2280_v23  ;;  %v2286_v26 = vsel %vm978_vm2, %v2271_v24, -inf }
 0xd57   : > { %2287 = vmax.xlane.f32.xlu1 %v2286_v26 }
 0xd5b   : > { %2290 = vmax.xlane.f32.xlu1 %v2289_v27 }
 0xddc   : > { %v2285_v32 = vpop.xlane.xlu1 %2284 }
 0xddd   : > { %v2293_v2 = vsub.f32 %v5047_v19, %v2285_v32 }
 0xddf   : > { %v2298_v44 = vmul.f32 1.442695, %v2293_v2 }
 0xde0   : > { %v2282_v36 = vpop.xlane.xlu1 %2281 }
 0xde1   : > { %5609 = vpow2.f32 %v2298_v44  ;;  %v2292_v8 = vsub.f32 %v2261_v21, %v2282_v36 }
 0xde3   : > { %v2296_v45 = vmul.f32 1.442695, %v2292_v8 }
 0xde4   : > { %v2288_v37 = vpop.xlane.xlu1 %2287 }
 0xde5   : > { %5611 = vpow2.f32 %v2296_v45  ;;  %v2294_v35 = vsub.f32 %v2271_v24, %v2288_v37 }
 0xde7   : > { %v2300_v6 = vmul.f32 1.442695, %v2294_v35 }
 0xde8   : > { %v2291_v0 = vpop.xlane.xlu1 %2290 }
 0xde9   : > { %v2295_v63 = vsub.f32 %v5050_v22, %v2291_v0 }
 0xdeb   : > { %v5610_v3 = vpop.eup %5609  ;;  %v2302_v30 = vmul.f32 1.442695, %v2295_v63 }
 0xdec   : > { %v2307_v40 = vsel %vm978_vm2, %v5610_v3, 0.0 }
 0xded   : > { %5613 = vpow2.f32 %v2302_v30  ;;  %2308 = vadd.xlane.f32.xlu0 %v2307_v40 }
 0xdee   : > { %5615 = vpow2.f32 %v2300_v6 }
 0xdef   : > { %v5612_v39 = vpop.eup %5611 }
 0xdf0   : > { %v2304_v38 = vsel %vm978_vm2, %v5612_v39, 0.0 }
 0xdf1   : > { %2305 = vadd.xlane.f32.xlu1 %v2304_v38 }
 0xdf7   : > { %v5614_v7 = vpop.eup %5613 }
 0xdf8   : > { %v2313_v9 = vsel %vm978_vm2, %v5614_v7, 0.0  ;;  %v5616_v11 = vpop.eup %5615 }
 0xdf9   : > { %2314 = vadd.xlane.f32.xlu1 %v2313_v9  ;;  %v2310_v41 = vsel %vm978_vm2, %v5616_v11, 0.0 }
 0xdfd   : > { %2311 = vadd.xlane.f32.xlu1 %v2310_v41 }
 0xe0e   : > { %2324 = vrot.lane.b32.xlu1 %v6260_v25, %s5764_s24  ;;  %v768_v25 = vadd.f32 %v6062_v46, %v6005_v1 }
 0xe12   : > { %2326 = vrot.lane.b32.xlu1 %v6256_v4, %s5764_s24 }
 0xe16   : > { %5542 = vrot.lane.b32.xlu1 %v5541_v13, %s5763_s23 }
 0xe3f   : > { %2577 = vxpose.xlu1.b32.start [1/2] (short) (narrow) %v763_v14, 32 }
 0xe43   : > { %2578 = vxpose.xlu1.b32.end [2/2] (short) (narrow) %v768_v25, 32 }
 0xe69   : > { %2758 = vrot.lane.b32.xlu1 %v773_v29, %s5764_s24 }
 0xe7a   : > { %v2309_v48 = vpop.xlane.xlu0 %2308 }
 0xe7b   : > { %5617 = vrcp.f32 %v2309_v48 }
 0xe7e   : > { %v2306_v49 = vpop.xlane.xlu1 %2305 }
 0xe7f   : > { %5619 = vrcp.f32 %v2306_v49 }
 0xe85   : > { %v5618_v4 = vpop.eup %5617 }
 0xe86   : > { %v2315_v15 = vpop.xlane.xlu1 %2314  ;;  %v2321_v42 = vmul.f32 %v5618_v4, %v5610_v3 }
 0xe87   : > { %5621 = vrcp.f32 %v2315_v15 }
 0xe89   : > { %v5620_v16 = vpop.eup %5619 }
 0xe8a   : > { %v2312_v17 = vpop.xlane.xlu1 %2311  ;;  %v2320_v18 = vmul.f32 %v5620_v16, %v5612_v39 }
 0xe8b   : > { %5623 = vrcp.f32 %v2312_v17 }
 0xe8c   : > { %v5341_v47 = vpack.c.bf16 %v2321_v42, %v2320_v18 }
 0xe8e   : > { %v2325_v19 = vpop.permute.xlu1 %2324  ;;  %5343 = vmatprep.subr.msk.bf16.mxu1 %vm6141_vm3, %v5341_v47 }
 0xe8f   : > { %5346 = vmatpush3.bf16.xpose.msk.msra.mxu1 %vm6141_vm3, %v5341_v47  ;;  %5059 = vmatprep.mubr.msk.f32.mxu1 %vm978_vm2, %v2325_v19 }
 0xe91   : > { %v5622_v1 = vpop.eup %5621 }
 0xe92   : > { %v2323_v21 = vmul.f32 %v5622_v1, %v5614_v7  ;;  %v2327_v23 = vpop.permute.xlu1 %2326 }
 0xe95   : > { %v5624_v46 = vpop.eup %5623 }
 0xe96   : > { %v2322_v20 = vmul.f32 %v5624_v46, %v5616_v11  ;;  %v5543_v24 = vpop.permute.xlu1 %5542 }
 0xe97   : > { %v5545_v45 = vunpack.i.h.bf16 %v5543_v24  ;;  %v5544_v37 = vunpack.i.l.bf16 %v5543_v24 }
 0xe98   : > { %v5347_v22 = vpack.c.bf16 %v2323_v21, %v2322_v20 }
 0xe99   : > { %v5364_v3 = vpack.c.bf16 %v5545_v45, %v5544_v37 }
 0xe9a   : > { %5349 = vmatprep.subr.msk.bf16.mxu1 %vm6141_vm3, %v5347_v22 }
 0xe9b   : > { %5352 = vmatpush3.bf16.xpose.msk.msra.mxu1 %vm6141_vm3, %v5347_v22 }
 0xea2   : > { %5060 = vmatmul.mubr.msk.f32.vlgmr.msra.gmra.mrb[44].mxu1 %vm978_vm2, %v2327_v23 }
 0xebf   : > { %v2593_v26 = vpop.trf.xlu1 }
 0xec3   : > { %v2594_v27 = vpop.trf.xlu1 }
 0xec7   : > { %v2595_v32 = vpop.trf.xlu1 }
 0xecb   : > { %v2596_v2 = vpop.trf.xlu1 }
 0xedb   : > { %v2759_v44 = vpop.permute.xlu1 %2758 }
 0xedc   : > { %5098 = vmatprep.mubr.msk.f32.mxu1 %vm978_vm2, %v2759_v44 }
 0xf75   : > { %v5061_v36 = vpop.f32.mrb[44].mxu1 }
 0xf76   : > { %v2410_v8 = vpop.f32.mrb[45].mxu1 }
 0xf77   : > { %5070 = vmatprep.mubr.msk.f32.mxu0 %vm978_vm2, %v2410_v8 }
 0xf78   : > { %5071 = vmatmul.mubr.msk.f32.vlgmr.msra.gmra.mrb[54].mxu0 %vm978_vm2, %v5061_v36 }
 0xf79   : > { %5077 = vmatprep.mubr.msk.f32.mxu0 %vm5766_vm4, %v5767_v28 }
0x104b   : > { %v5072_v35 = vpop.f32.mrb[54].mxu0 }
0x104c   : > { %v2491_v0 = vpop.f32.mrb[55].mxu0 }
0x104d   : > { %v5362_v63 = vpack.c.bf16 %v5072_v35, %v2491_v0 }
0x104f   : > { %5363 = vmatpush3.bf16.msra.mxu0 %v5362_v63 }
0x1050   : > { %5365 = vmatprep.subr.bf16.mxu0 %v5364_v3 }
0x1052   : > { %5078 = vmatmul.mubr.msk.f32.vlgmr.msra.gmra.mrb[56].mxu0 %vm519_vm1, %v6193_v31 }
0x1053   : > { %5367 = vmatpush3.bf16.msra.mxu0 %v5364_v3  ;;  %5084 = vmatprep.mubr.msk.f32.mxu0 %vm519_vm1, %v2593_v26  ;;  %v6358_v26 = vld [vmem:[%s6628_s1 + $0x110] ss:$0 sm:$0xff] }
0x1054   : > { %5381 = vmatprep.subr.bf16.mxu0 %v6128_v62  ;;  %v783_v44 = vadd.f32 %v6358_v26, %v6072_v51 }
0x1056   : > { %5085 = vmatmul.mubr.msk.f32.vlgmr.msra.gmra.mrb[58].mxu0 %vm519_vm1, %v2594_v27  ;;  %v6362_v27 = vadd.f32 %v6358_v26, %v6074_v52  ;;  %v788_v52 = vadd.f32 %v6358_v26, %v6070_v50 }
0x1057   : > { %5087 = vmatprep.mubr.msk.f32.mxu0 %vm519_vm1, %v2595_v32  ;;  %5383 = vmatpush3.bf16.msra.mxu0 %v6128_v62  ;;  %v6366_v32 = vadd.f32 %v6358_v26, %v6076_v53 }
0x1058   : > { %5385 = vmatprep.subr.bf16.mxu0 %v6133_v33 }
0x105a   : > { %5088 = vmatmul.mubr.msk.f32.gmra.mrb[60].mxu0 %vm519_vm1, %v2596_v2  ;;  %v5546_v2 = vpack.i.bf16 %v6362_v27, %v6366_v32 }
0x105b   : > { %5387 = vmatpush3.bf16.msra.mxu0 %v6133_v33 }
0x105c   : > { %5388 = vmatprep.subr.bf16.mxu0 %v5765_v5 }
0x1125   : > { %v6345_v6 = vpop.f32.mrb[56].mxu0 }
0x1126   : > { %v5079_v30 = vpop.f32.mrb[57].mxu0 }
0x1129   : > { %v5086_v40 = vpop.f32.mrb[58].mxu0 }
0x112a   : > { %v2717_v39 = vsel %vm978_vm2, %v5086_v40, -inf  ;;  %v2695_v38 = vpop.f32.mrb[59].mxu0 }
0x112b   : > { %2718 = vmax.xlane.f32.xlu0 %v2717_v39  ;;  %v2714_v9 = vsel %vm978_vm2, %v2695_v38, -inf }
0x112d   : > { %v5089_v7 = vpop.f32.mrb[60].mxu0 }
0x112e   : > { %v2705_v11 = vpop.f32.mrb[61].mxu0  ;;  %v2723_v29 = vsel %vm978_vm2, %v5089_v7, -inf }
0x112f   : > { %2715 = vmax.xlane.f32.xlu0 %v2714_v9  ;;  %v2720_v41 = vsel %vm978_vm2, %v2705_v11, -inf }
0x1133   : > { %2721 = vmax.xlane.f32.xlu0 %v2720_v41 }
0x1137   : > { %2724 = vmax.xlane.f32.xlu0 %v2723_v29 }
0x11b8   : > { %v2719_v13 = vpop.xlane.xlu0 %2718 }
0x11b9   : > { %v2727_v14 = vsub.f32 %v5086_v40, %v2719_v13 }
0x11bb   : > { %v2732_v25 = vmul.f32 1.442695, %v2727_v14 }
0x11bc   : > { %v2716_v48 = vpop.xlane.xlu0 %2715 }
0x11bd   : > { %5625 = vpow2.f32 %v2732_v25  ;;  %v2726_v49 = vsub.f32 %v2695_v38, %v2716_v48 }
0x11bf   : > { %v2730_v15 = vmul.f32 1.442695, %v2726_v49 }
0x11c0   : > { %v2722_v4 = vpop.xlane.xlu0 %2721 }
0x11c1   : > { %5627 = vpow2.f32 %v2730_v15  ;;  %v2728_v16 = vsub.f32 %v2705_v11, %v2722_v4 }
0x11c3   : > { %v2734_v17 = vmul.f32 1.442695, %v2728_v16 }
0x11c4   : > { %v2725_v18 = vpop.xlane.xlu0 %2724 }
0x11c5   : > { %5629 = vpow2.f32 %v2734_v17  ;;  %v2729_v42 = vsub.f32 %v5089_v7, %v2725_v18 }
0x11c7   : > { %v5626_v47 = vpop.eup %5625  ;;  %v2736_v19 = vmul.f32 1.442695, %v2729_v42 }
0x11c8   : > { %v2741_v1 = vsel %vm978_vm2, %v5626_v47, 0.0 }
0x11c9   : > { %5631 = vpow2.f32 %v2736_v19  ;;  %2742 = vadd.xlane.f32.xlu0 %v2741_v1 }
0x11cb   : > { %v5628_v46 = vpop.eup %5627 }
0x11cc   : > { %v2738_v20 = vsel %vm978_vm2, %v5628_v46, 0.0 }
0x11cd   : > { %2739 = vadd.xlane.f32.xlu0 %v2738_v20 }
0x11cf   : > { %v5630_v21 = vpop.eup %5629 }
0x11d0   : > { %v2744_v22 = vsel %vm978_vm2, %v5630_v21, 0.0 }
0x11d1   : > { %2745 = vadd.xlane.f32.xlu0 %v2744_v22  ;;  %v6409_v22 = vadd.f32 %v6358_v26, %v6082_v56 }
0x11d3   : > { %v5632_v23 = vpop.eup %5631 }
0x11d4   : > { %v2747_v24 = vsel %vm978_vm2, %v5632_v23, 0.0 }
0x11d5   : > { %2748 = vadd.xlane.f32.xlu0 %v2747_v24 }
0x11eb   : > { %2760 = vrot.lane.b32.xlu0 %v6306_v12, %s5764_s24 }
0x11ef   : > { %5547 = vrot.lane.b32.xlu0 %v5546_v2, %s5763_s23 }
0x120d   : > { %3011 = vxpose.xlu0.b32.start [1/2] (short) (narrow) %v783_v44, 32 }
0x1211   : > { %3012 = vxpose.xlu0.b32.end [2/2] (short) (narrow) %v788_v52, 32 }
0x1256   : > { %v2743_v36 = vpop.xlane.xlu0 %2742 }
0x1257   : > { %5633 = vrcp.f32 %v2743_v36 }
0x125a   : > { %v2740_v53 = vpop.xlane.xlu0 %2739 }
0x125b   : > { %5635 = vrcp.f32 %v2740_v53 }
0x125e   : > { %v2746_v8 = vpop.xlane.xlu0 %2745 }
0x125f   : > { %5637 = vrcp.f32 %v2746_v8 }
0x1261   : > { %v5634_v45 = vpop.eup %5633 }
0x1262   : > { %v2749_v12 = vpop.xlane.xlu0 %2748  ;;  %v2755_v0 = vmul.f32 %v5634_v45, %v5626_v47 }
0x1263   : > { %5639 = vrcp.f32 %v2749_v12 }
0x1265   : > { %v5636_v37 = vpop.eup %5635 }
0x1266   : > { %v2754_v35 = vmul.f32 %v5636_v37, %v5628_v46  ;;  %v2761_v39 = vpop.permute.xlu0 %2760 }
0x1268   : > { %v5368_v63 = vpack.c.bf16 %v2755_v0, %v2754_v35 }
0x1269   : > { %v5638_v51 = vpop.eup %5637 }
0x126a   : > { %5370 = vmatprep.subr.msk.bf16.mxu1 %vm6141_vm3, %v5368_v63  ;;  %v2756_v3 = vmul.f32 %v5638_v51, %v5630_v21  ;;  %v5548_v9 = vpop.permute.xlu0 %5547 }
0x126b   : > { %5373 = vmatpush3.bf16.xpose.msk.msra.mxu1 %vm6141_vm3, %v5368_v63  ;;  %v5550_v41 = vunpack.i.h.bf16 %v5548_v9  ;;  %v5549_v29 = vunpack.i.l.bf16 %v5548_v9 }
0x126d   : > { %v5640_v50 = vpop.eup %5639  ;;  %v5391_v49 = vpack.c.bf16 %v5550_v41, %v5549_v29 }
0x126e   : > { %v2757_v30 = vmul.f32 %v5640_v50, %v5632_v23  ;;  %v6413_v23 = vadd.f32 %v6358_v26, %v6084_v57 }
0x1270   : > { %v5374_v40 = vpack.c.bf16 %v2757_v30, %v2756_v3  ;;  %v5551_v24 = vpack.i.bf16 %v6409_v22, %v6413_v23 }
0x1272   : > { %5376 = vmatprep.subr.msk.bf16.mxu1 %vm6141_vm3, %v5374_v40 }
0x1273   : > { %5379 = vmatpush3.bf16.xpose.msk.msra.mxu1 %vm6141_vm3, %v5374_v40 }
0x127a   : > { %5099 = vmatmul.mubr.msk.f32.vlgmr.msra.gmra.mrb[46].mxu1 %vm978_vm2, %v2761_v39 }
0x128d   : > { %v3027_v11 = vpop.trf.xlu0 }
0x1291   : > { %v3028_v14 = vpop.trf.xlu0 }
0x1295   : > { %v3029_v15 = vpop.trf.xlu0 }
0x1299   : > { %v3030_v4 = vpop.trf.xlu0 }
0x134d   : > { %v5100_v38 = vpop.f32.mrb[46].mxu1 }
0x134e   : > { %v2844_v7 = vpop.f32.mrb[47].mxu1 }
0x134f   : > { %5109 = vmatprep.mubr.msk.f32.mxu0 %vm978_vm2, %v2844_v7  ;;  %v808_v7 = vadd.f32 %v6358_v26, %v6078_v54 }
0x1350   : > { %5110 = vmatmul.mubr.msk.f32.vlgmr.msra.gmra.mrb[62].mxu0 %vm978_vm2, %v5100_v38  ;;  %v803_v38 = vadd.f32 %v6358_v26, %v6080_v55 }
0x1351   : > { %5116 = vmatprep.mubr.msk.f32.mxu0 %vm5766_vm4, %v5767_v28 }
0x1423   : > { %v5111_v13 = vpop.f32.mrb[62].mxu0 }
0x1424   : > { %v2925_v25 = vpop.f32.mrb[63].mxu0 }
0x1425   : > { %v5389_v48 = vpack.c.bf16 %v5111_v13, %v2925_v25 }
0x1427   : > { %5390 = vmatpush3.bf16.msra.mxu0 %v5389_v48 }
0x1428   : > { %5392 = vmatprep.subr.bf16.mxu0 %v5391_v49 }
0x142a   : > { %5117 = vmatmul.mubr.msk.f32.vlgmr.msra.gmra.mrb[64].mxu0 %vm519_vm1, %v6193_v31 }
0x142b   : > { %5394 = vmatpush3.bf16.msra.mxu0 %v5391_v49  ;;  %5123 = vmatprep.mubr.msk.f32.mxu0 %vm519_vm1, %v3027_v11 }
0x142c   : > { %5408 = vmatprep.subr.bf16.mxu0 %v6128_v62 }
0x142e   : > { %5124 = vmatmul.mubr.msk.f32.vlgmr.msra.gmra.mrb[66].mxu0 %vm519_vm1, %v3028_v14 }
0x142f   : > { %5126 = vmatprep.mubr.msk.f32.mxu0 %vm519_vm1, %v3029_v15  ;;  %5410 = vmatpush3.bf16.msra.mxu0 %v6128_v62 }
0x1430   : > { %5412 = vmatprep.subr.bf16.mxu0 %v6133_v33 }
0x1432   : > { %5127 = vmatmul.mubr.msk.f32.gmra.mrb[68].mxu0 %vm519_vm1, %v3030_v4 }
0x1433   : > { %5414 = vmatpush3.bf16.msra.mxu0 %v6133_v33 }
0x1434   : > { %5415 = vmatprep.subr.bf16.mxu0 %v5765_v5 }
0x14fd   : > { %v6401_v16 = vpop.f32.mrb[64].mxu0 }
0x14fe   : > { %v5118_v17 = vpop.f32.mrb[65].mxu0 }
0x1501   : > { %v5125_v18 = vpop.f32.mrb[66].mxu0 }
0x1502   : > { %v3129_v42 = vpop.f32.mrb[67].mxu0  ;;  %v3151_v47 = vsel %vm978_vm2, %v5125_v18, -inf }
0x1503   : > { %3152 = vmax.xlane.f32.xlu0 %v3151_v47  ;;  %v3148_v19 = vsel %vm978_vm2, %v3129_v42, -inf }
0x1504   : > { %3149 = vmax.xlane.f32.xlu1 %v3148_v19 }
0x1505   : > { %v5128_v1 = vpop.f32.mrb[68].mxu0 }
0x1506   : > { %v3139_v46 = vpop.f32.mrb[69].mxu0  ;;  %v3157_v21 = vsel %vm978_vm2, %v5128_v1, -inf }
0x1507   : > { %v3154_v20 = vsel %vm978_vm2, %v3139_v46, -inf }
0x1508   : > { %3155 = vmax.xlane.f32.xlu1 %v3154_v20 }
0x150c   : > { %3158 = vmax.xlane.f32.xlu1 %v3157_v21 }
0x1519   : > { %5552 = vrot.lane.b32.xlu0 %v5551_v24, %s5763_s23 }
0x1590   : > { %v3153_v2 = vpop.xlane.xlu0 %3152 }
0x1591   : > { %v3161_v44 = vsub.f32 %v5125_v18, %v3153_v2  ;;  %v3150_v52 = vpop.xlane.xlu1 %3149 }
0x1592   : > { %v3160_v36 = vsub.f32 %v3129_v42, %v3150_v52 }
0x1593   : > { %v3166_v53 = vmul.f32 1.442695, %v3161_v44 }
0x1594   : > { %v3164_v8 = vmul.f32 1.442695, %v3160_v36  ;;  %v5553_v19 = vpop.permute.xlu0 %5552 }
0x1595   : > { %5641 = vpow2.f32 %v3166_v53  ;;  %v3156_v12 = vpop.xlane.xlu1 %3155 }
0x1596   : > { %5643 = vpow2.f32 %v3164_v8  ;;  %v3162_v56 = vsub.f32 %v3139_v46, %v3156_v12  ;;  %v5554_v46 = vunpack.i.l.bf16 %v5553_v19 }
0x1598   : > { %v3168_v35 = vmul.f32 1.442695, %v3162_v56 }
0x1599   : > { %v3159_v45 = vpop.xlane.xlu1 %3158 }
0x159a   : > { %v3163_v37 = vsub.f32 %v5128_v1, %v3159_v45  ;;  %v5555_v1 = vunpack.i.h.bf16 %v5553_v19 }
0x159c   : > { %v3170_v57 = vmul.f32 1.442695, %v3163_v37  ;;  %v5418_v44 = vpack.c.bf16 %v5555_v1, %v5554_v46 }
0x159e   : > { %5645 = vpow2.f32 %v3170_v57 }
0x159f   : > { %v5642_v0 = vpop.eup %5641  ;;  %5647 = vpow2.f32 %v3168_v35 }
0x15a0   : > { %v3175_v63 = vsel %vm978_vm2, %v5642_v0, 0.0  ;;  %v5644_v51 = vpop.eup %5643 }
0x15a1   : > { %3176 = vadd.xlane.f32.xlu1 %v3175_v63  ;;  %v3172_v50 = vsel %vm978_vm2, %v5644_v51, 0.0 }
0x15a5   : > { %3173 = vadd.xlane.f32.xlu1 %v3172_v50 }
0x15a8   : > { %v5646_v3 = vpop.eup %5645 }
0x15a9   : > { %v3181_v30 = vsel %vm978_vm2, %v5646_v3, 0.0  ;;  %v5648_v40 = vpop.eup %5647 }
0x15aa   : > { %3182 = vadd.xlane.f32.xlu1 %v3181_v30  ;;  %v3178_v39 = vsel %vm978_vm2, %v5648_v40, 0.0 }
0x15ae   : > { %3179 = vadd.xlane.f32.xlu1 %v3178_v39 }
0x15bf   : > { %3192 = vrot.lane.b32.xlu1 %v6366_v32, %s5764_s24 }
0x15c3   : > { %3194 = vrot.lane.b32.xlu1 %v6362_v27, %s5764_s24 }
0x15ec   : > { %3445 = vxpose.xlu1.b32.start [1/2] (short) (narrow) %v803_v38, 32 }
0x15f0   : > { %3446 = vxpose.xlu1.b32.end [2/2] (short) (narrow) %v808_v7, 32 }
0x162e   : > { %v3177_v9 = vpop.xlane.xlu1 %3176 }
0x162f   : > { %5649 = vrcp.f32 %v3177_v9 }
0x1632   : > { %v3174_v11 = vpop.xlane.xlu1 %3173 }
0x1633   : > { %5651 = vrcp.f32 %v3174_v11 }
0x1637   : > { %v3183_v41 = vpop.xlane.xlu1 %3182 }
0x1638   : > { %5653 = vrcp.f32 %v3183_v41 }
0x1639   : > { %v5650_v29 = vpop.eup %5649 }
0x163a   : > { %v3189_v27 = vmul.f32 %v5650_v29, %v5642_v0 }
0x163b   : > { %v3180_v13 = vpop.xlane.xlu1 %3179 }
0x163c   : > { %5655 = vrcp.f32 %v3180_v13 }
0x163d   : > { %v5652_v32 = vpop.eup %5651 }
0x163e   : > { %v3188_v14 = vmul.f32 %v5652_v32, %v5644_v51 }
0x163f   : > { %v3193_v25 = vpop.permute.xlu1 %3192 }
0x1640   : > { %5137 = vmatprep.mubr.msk.f32.mxu1 %vm978_vm2, %v3193_v25  ;;  %v5395_v55 = vpack.c.bf16 %v3189_v27, %v3188_v14 }
0x1642   : > { %5397 = vmatprep.subr.msk.bf16.mxu1 %vm6141_vm3, %v5395_v55  ;;  %v5654_v54 = vpop.eup %5653 }
0x1643   : > { %5400 = vmatpush3.bf16.xpose.msk.msra.mxu1 %vm6141_vm3, %v5395_v55  ;;  %v3191_v15 = vmul.f32 %v5654_v54, %v5646_v3  ;;  %v3195_v17 = vpop.permute.xlu1 %3194  ;;  %v6469_v54 = vadd.f32 %v6358_v26, %v6090_v60  ;;  %v828_v60 = vadd.f32 %v6358_v26, %v6086_v58 }
0x1646   : > { %v5656_v48 = vpop.eup %5655 }
0x1647   : > { %v3190_v49 = vmul.f32 %v5656_v48, %v5648_v40  ;;  %v6473_v48 = vadd.f32 %v6358_v26, %v6092_v61 }
0x1649   : > { %v5401_v4 = vpack.c.bf16 %v3191_v15, %v3190_v49  ;;  %v5556_v49 = vpack.i.bf16 %v6469_v54, %v6473_v48  ;;  %v823_v15 = vadd.f32 %v6358_v26, %v6088_v59 }
0x164b   : > { %5403 = vmatprep.subr.msk.bf16.mxu1 %vm6141_vm3, %v5401_v4 }
0x164c   : > { %5406 = vmatpush3.bf16.xpose.msk.msra.mxu1 %vm6141_vm3, %v5401_v4 }
0x1653   : > { %5138 = vmatmul.mubr.msk.f32.vlgmr.msra.gmra.mrb[48].mxu1 %vm978_vm2, %v3195_v17 }
0x166c   : > { %v3461_v47 = vpop.trf.xlu1 }
0x1670   : > { %v3462_v21 = vpop.trf.xlu1 }
0x1674   : > { %v3463_v52 = vpop.trf.xlu1 }
0x1678   : > { %v3464_v36 = vpop.trf.xlu1 }
0x1726   : > { %v5139_v18 = vpop.f32.mrb[48].mxu1 }
0x1727   : > { %v3278_v42 = vpop.f32.mrb[49].mxu1 }
0x1728   : > { %5148 = vmatprep.mubr.msk.f32.mxu0 %vm978_vm2, %v3278_v42 }
0x1729   : > { %5149 = vmatmul.mubr.msk.f32.vlgmr.msra.gmra.mrb[70].mxu0 %vm978_vm2, %v5139_v18 }
0x172a   : > { %5155 = vmatprep.mubr.msk.f32.mxu0 %vm5766_vm4, %v5767_v28 }
0x17fc   : > { %v5150_v20 = vpop.f32.mrb[70].mxu0 }
0x17fd   : > { %v3359_v24 = vpop.f32.mrb[71].mxu0 }
0x17fe   : > { %v5416_v2 = vpack.c.bf16 %v5150_v20, %v3359_v24 }
0x1800   : > { %5417 = vmatpush3.bf16.msra.mxu0 %v5416_v2 }
0x1801   : > { %5419 = vmatprep.subr.bf16.mxu0 %v5418_v44 }
0x1803   : > { %5156 = vmatmul.mubr.msk.f32.vlgmr.msra.gmra.mrb[72].mxu0 %vm519_vm1, %v6193_v31 }
0x1804   : > { %5421 = vmatpush3.bf16.msra.mxu0 %v5418_v44  ;;  %5162 = vmatprep.mubr.msk.f32.mxu0 %vm519_vm1, %v3461_v47 }
0x1805   : > { %5435 = vmatprep.subr.bf16.mxu0 %v6128_v62 }
0x1807   : > { %5163 = vmatmul.mubr.msk.f32.vlgmr.msra.gmra.mrb[74].mxu0 %vm519_vm1, %v3462_v21 }
0x1808   : > { %5165 = vmatprep.mubr.msk.f32.mxu0 %vm519_vm1, %v3463_v52  ;;  %5437 = vmatpush3.bf16.msra.mxu0 %v6128_v62 }
0x1809   : > { %5439 = vmatprep.subr.bf16.mxu0 %v6133_v33 }
0x180b   : > { %5166 = vmatmul.mubr.msk.f32.gmra.mrb[76].mxu0 %vm519_vm1, %v3464_v36 }
0x180c   : > { %5441 = vmatpush3.bf16.msra.mxu0 %v6133_v33 }
0x180d   : > { %5442 = vmatprep.subr.bf16.mxu0 %v5765_v5 }
0x18d6   : > { %v6455_v31 = vpop.f32.mrb[72].mxu0 }
0x18d7   : > { %v5157_v53 = vpop.f32.mrb[73].mxu0 }
0x18da   : > { %v5164_v8 = vpop.f32.mrb[74].mxu0 }
0x18db   : > { %v3563_v12 = vpop.f32.mrb[75].mxu0  ;;  %v3585_v56 = vsel %vm978_vm2, %v5164_v8, -inf }
0x18dc   : > { %3586 = vmax.xlane.f32.xlu1 %v3585_v56  ;;  %v3582_v45 = vsel %vm978_vm2, %v3563_v12, -inf }
0x18dd   : > { %3583 = vmax.xlane.f32.xlu0 %v3582_v45 }
0x18de   : > { %v5167_v37 = vpop.f32.mrb[76].mxu0 }
0x18df   : > { %v3573_v35 = vpop.f32.mrb[77].mxu0  ;;  %v3591_v0 = vsel %vm978_vm2, %v5167_v37, -inf }
0x18e0   : > { %v3588_v57 = vsel %vm978_vm2, %v3573_v35, -inf }
0x18e1   : > { %3589 = vmax.xlane.f32.xlu0 %v3588_v57 }
0x18e5   : > { %3592 = vmax.xlane.f32.xlu0 %v3591_v0  ;;  %v6501_v0 = vld [vmem:[%s6628_s1 + $0x138] sm:$0x7] }
0x18ed   : > { %3628 = vrot.lane.b32.xlu1 %v6409_v22, %s5764_s24 }
0x1969   : > { %v3587_v63 = vpop.xlane.xlu1 %3586 }
0x196a   : > { %v3595_v51 = vsub.f32 %v5164_v8, %v3587_v63  ;;  %v3584_v50 = vpop.xlane.xlu0 %3583 }
0x196b   : > { %v3594_v3 = vsub.f32 %v3563_v12, %v3584_v50 }
0x196c   : > { %v3600_v30 = vmul.f32 1.442695, %v3595_v51 }
0x196d   : > { %v3598_v40 = vmul.f32 1.442695, %v3594_v3  ;;  %v3629_v24 = vpop.permute.xlu1 %3628 }
0x196e   : > { %5657 = vpow2.f32 %v3600_v30  ;;  %v3590_v39 = vpop.xlane.xlu0 %3589 }
0x196f   : > { %v3596_v38 = vsub.f32 %v3573_v35, %v3590_v39  ;;  %5659 = vpow2.f32 %v3598_v40 }
0x1971   : > { %v3602_v7 = vmul.f32 1.442695, %v3596_v38 }
0x1972   : > { %v3593_v9 = vpop.xlane.xlu0 %3592 }
0x1973   : > { %v3597_v11 = vsub.f32 %v5167_v37, %v3593_v9  ;;  %5661 = vpow2.f32 %v3602_v7 }
0x1975   : > { %v3604_v41 = vmul.f32 1.442695, %v3597_v11  ;;  %v5692_v11 = vld [vmem:[%s5851_s3 + $0x8] sm:$0xff] }
0x1977   : > { %5663 = vpow2.f32 %v3604_v41 }
0x1978   : > { %v5658_v29 = vpop.eup %5657 }
0x1979   : > { %v3609_v13 = vsel %vm978_vm2, %v5658_v29, 0.0  ;;  %v5660_v22 = vpop.eup %5659 }
0x197a   : > { %3610 = vadd.xlane.f32.xlu0 %v3609_v13  ;;  %v3606_v32 = vsel %vm978_vm2, %v5660_v22, 0.0 }
0x197d   : > { %v5662_v14 = vpop.eup %5661 }
0x197e   : > { %3607 = vadd.xlane.f32.xlu0 %v3606_v32  ;;  %v3612_v27 = vsel %vm978_vm2, %v5662_v14, 0.0 }
0x1981   : > { %v5664_v25 = vpop.eup %5663 }
0x1982   : > { %3613 = vadd.xlane.f32.xlu0 %v3612_v27  ;;  %v3615_v55 = vsel %vm978_vm2, %v5664_v25, 0.0 }
0x1986   : > { %3616 = vadd.xlane.f32.xlu0 %v3615_v55 }
0x199c   : > { %3626 = vrot.lane.b32.xlu0 %v6413_v23, %s5764_s24 }
0x19a0   : > { %5557 = vrot.lane.b32.xlu0 %v5556_v49, %s5763_s23 }
0x19be   : > { %3879 = vxpose.xlu0.b32.start [1/2] (short) (narrow) %v823_v15, 32 }
0x19c2   : > { %3880 = vxpose.xlu0.b32.end [2/2] (short) (narrow) %v828_v60, 32 }
0x1a07   : > { %v3611_v4 = vpop.xlane.xlu0 %3610 }
0x1a08   : > { %5665 = vrcp.f32 %v3611_v4 }
0x1a0b   : > { %v3608_v61 = vpop.xlane.xlu0 %3607 }
0x1a0c   : > { %5667 = vrcp.f32 %v3608_v61 }
0x1a0f   : > { %v3614_v17 = vpop.xlane.xlu0 %3613 }
0x1a10   : > { %5669 = vrcp.f32 %v3614_v17 }
0x1a12   : > { %v5666_v18 = vpop.eup %5665 }
0x1a13   : > { %v3617_v23 = vpop.xlane.xlu0 %3616  ;;  %v3623_v1 = vmul.f32 %v5666_v18, %v5658_v29 }
0x1a14   : > { %5671 = vrcp.f32 %v3617_v23 }
0x1a16   : > { %v5668_v42 = vpop.eup %5667 }
0x1a17   : > { %v3627_v47 = vpop.permute.xlu0 %3626  ;;  %v3622_v19 = vmul.f32 %v5668_v42, %v5660_v22 }
0x1a18   : > { %5176 = vmatprep.mubr.msk.f32.mxu1 %vm978_vm2, %v3627_v47 }
0x1a19   : > { %v5422_v59 = vpack.c.bf16 %v3623_v1, %v3622_v19 }
0x1a1a   : > { %v5670_v58 = vpop.eup %5669 }
0x1a1b   : > { %5424 = vmatprep.subr.msk.bf16.mxu1 %vm6141_vm3, %v5422_v59  ;;  %v3624_v46 = vmul.f32 %v5670_v58, %v5662_v14  ;;  %v5558_v52 = vpop.permute.xlu0 %5557  ;;  %v5693_v58 = vld [vmem:[%s5851_s3 + $0x10] sm:$0xff] }
0x1a1c   : > { %5427 = vmatpush3.bf16.xpose.msk.msra.mxu1 %vm6141_vm3, %v5422_v59  ;;  %v5560_v53 = vunpack.i.h.bf16 %v5558_v52  ;;  %v5559_v8 = vunpack.i.l.bf16 %v5558_v52  ;;  %v5697_v52 = vld [vmem:[%s5851_s3 + $0x30] sm:$0xff] }
0x1a1e   : > { %v5672_v26 = vpop.eup %5671  ;;  %v5445_v35 = vpack.c.bf16 %v5560_v53, %v5559_v8 }
0x1a1f   : > { %v3625_v20 = vmul.f32 %v5672_v26, %v5664_v25 }
0x1a21   : > { %v5428_v21 = vpack.c.bf16 %v3625_v20, %v3624_v46  ;;  %v5694_v20 = vld [vmem:[%s5851_s3 + $0x18] sm:$0xff] }
0x1a23   : > { %5430 = vmatprep.subr.msk.bf16.mxu1 %vm6141_vm3, %v5428_v21 }
0x1a24   : > { %5433 = vmatpush3.bf16.xpose.msk.msra.mxu1 %vm6141_vm3, %v5428_v21 }
0x1a2b   : > { %5177 = vmatmul.mubr.msk.f32.vlgmr.msra.gmra.mrb[50].mxu1 %vm978_vm2, %v3629_v24 }
0x1a3e   : > { %v3895_v36 = vpop.trf.xlu0 }
0x1a42   : > { %v3896_v56 = vpop.trf.xlu0 }
0x1a46   : > { %v3897_v57 = vpop.trf.xlu0 }
0x1a4a   : > { %v3898_v63 = vpop.trf.xlu0 }
0x1afe   : > { %v5178_v2 = vpop.f32.mrb[50].mxu1 }
0x1aff   : > { %v3712_v44 = vpop.f32.mrb[51].mxu1 }
0x1b00   : > { %5187 = vmatprep.mubr.msk.f32.mxu0 %vm978_vm2, %v3712_v44 }
0x1b01   : > { %5188 = vmatmul.mubr.msk.f32.vlgmr.msra.gmra.mrb[78].mxu0 %vm978_vm2, %v5178_v2  ;;  %v5696_v2 = vld [vmem:[%s5851_s3 + $0x28] sm:$0xff] }
0x1b02   : > { %5194 = vmatprep.mubr.msk.f32.mxu0 %vm5766_vm4, %v5767_v28 }
0x1bd4   : > { %v5189_v12 = vpop.f32.mrb[78].mxu0 }
0x1bd5   : > { %v3793_v45 = vpop.f32.mrb[79].mxu0 }
0x1bd6   : > { %v5443_v37 = vpack.c.bf16 %v5189_v12, %v3793_v45 }
0x1bd8   : > { %5444 = vmatpush3.bf16.msra.mxu0 %v5443_v37 }
0x1bd9   : > { %5446 = vmatprep.subr.bf16.mxu0 %v5445_v35 }
0x1bdb   : > { %5195 = vmatmul.mubr.msk.f32.vlgmr.msra.gmra.mrb[80].mxu0 %vm519_vm1, %v6501_v0 }
0x1bdc   : > { %5448 = vmatpush3.bf16.msra.mxu0 %v5445_v35  ;;  %5201 = vmatprep.mubr.msk.f32.mxu0 %vm519_vm1, %v3895_v36 }
0x1bdd   : > { %5462 = vmatprep.subr.bf16.mxu0 %v6128_v62 }
0x1bdf   : > { %5202 = vmatmul.mubr.msk.f32.vlgmr.msra.gmra.mrb[82].mxu0 %vm519_vm1, %v3896_v56 }
0x1be0   : > { %5204 = vmatprep.mubr.msk.f32.mxu0 %vm519_vm1, %v3897_v57  ;;  %5464 = vmatpush3.bf16.msra.mxu0 %v6128_v62 }
0x1be1   : > { %5466 = vmatprep.subr.bf16.mxu0 %v6133_v33 }
0x1be3   : > { %5205 = vmatmul.mubr.msk.f32.gmra.mrb[84].mxu0 %vm519_vm1, %v3898_v63 }
0x1be4   : > { %5468 = vmatpush3.bf16.msra.mxu0 %v6133_v33 }
0x1be5   : > { %5469 = vmatprep.subr.bf16.mxu0 %v5765_v5  ;;  %v6523_v5 = vld [vmem:[%s6628_s1 + $0x140] sm:$0x7] }
0x1be6   : > { %v1699_v9 = vadd.f32 %v6523_v5, %v6238_v34  ;;  %v2133_v59 = vadd.f32 %v6523_v5, %v6292_v43  ;;  %v2567_v46 = vadd.f32 %v6523_v5, %v6345_v6  ;;  %v5695_v43 = vld [vmem:[%s5851_s3 + $0x20] sm:$0xff] }
0x1be8   : > { %v1702_v41 = vadd.f32 %v5692_v11, %v1699_v9  ;;  %v2136_v26 = vadd.f32 %v5693_v58, %v2133_v59  ;;  %v2570_v21 = vadd.f32 %v5694_v20, %v2567_v46 }
0x1cae   : > { %v6514_v51 = vpop.f32.mrb[80].mxu0 }
0x1caf   : > { %v5196_v50 = vpop.f32.mrb[81].mxu0  ;;  %v3869_v6 = vadd.f32 %v6523_v5, %v6514_v51 }
0x1cb1   : > { %v3872_v36 = vadd.f32 %v5697_v52, %v3869_v6 }
0x1cb2   : > { %v5203_v3 = vpop.f32.mrb[82].mxu0 }
0x1cb3   : > { %v3997_v30 = vpop.f32.mrb[83].mxu0  ;;  %v4019_v40 = vsel %vm978_vm2, %v5203_v3, -inf }
0x1cb4   : > { %4020 = vmax.xlane.f32.xlu0 %v4019_v40  ;;  %v4016_v39 = vsel %vm978_vm2, %v3997_v30, -inf }
0x1cb5   : > { %4017 = vmax.xlane.f32.xlu1 %v4016_v39 }
0x1cb6   : > { %v5206_v62 = vpop.f32.mrb[84].mxu0 }
0x1cb7   : > { %v4007_v38 = vpop.f32.mrb[85].mxu0  ;;  %v4025_v33 = vsel %vm978_vm2, %v5206_v62, -inf }
0x1cb8   : > { %v4022_v7 = vsel %vm978_vm2, %v4007_v38, -inf }
0x1cb9   : > { %4023 = vmax.xlane.f32.xlu1 %v4022_v7 }
0x1cbd   : > { %4026 = vmax.xlane.f32.xlu1 %v4025_v33 }
0x1cca   : > { %1704 = vrot.lane.b32.xlu0 %v1702_v41, %s5768_s30 }
0x1d41   : > { %v4021_v29 = vpop.xlane.xlu0 %4020 }
0x1d42   : > { %v4029_v13 = vsub.f32 %v5203_v3, %v4021_v29  ;;  %v4018_v22 = vpop.xlane.xlu1 %4017 }
0x1d43   : > { %v4028_v32 = vsub.f32 %v3997_v30, %v4018_v22 }
0x1d44   : > { %v4034_v14 = vmul.f32 1.442695, %v4029_v13 }
0x1d45   : > { %v4032_v27 = vmul.f32 1.442695, %v4028_v32  ;;  %v1705_v25 = vpop.permute.xlu0 %1704 }
0x1d46   : > { %5673 = vpow2.f32 %v4034_v14  ;;  %1708 = vst.msk [vmem:[%s6220_s21] sm:$0x7] %vm1707_vm6, %v1705_v25  ;;  %v4024_v55 = vpop.xlane.xlu1 %4023  ;;  %v5698_v14 = vld [vmem:[%s5851_s3 + $0x38] sm:$0xff]  ;;  %s4314_s3 = scalar_lea.sflag [#allocation3], %s135_s8 }
0x1d47   : > { %5675 = vpow2.f32 %v4032_v27  ;;  %v4030_v49 = vsub.f32 %v4007_v38, %v4024_v55 }
0x1d49   : > { %v4036_v34 = vmul.f32 1.442695, %v4030_v49 }
0x1d4a   : > { %v4027_v15 = vpop.xlane.xlu1 %4026 }
0x1d4b   : > { %v4031_v60 = vsub.f32 %v5206_v62, %v4027_v15 }
0x1d4d   : > { %v4038_v4 = vmul.f32 1.442695, %v4031_v60 }
0x1d4f   : > { %5677 = vpow2.f32 %v4038_v4 }
0x1d50   : > { %v5674_v61 = vpop.eup %5673  ;;  %5679 = vpow2.f32 %v4036_v34 }
0x1d51   : > { %v4043_v17 = vsel %vm978_vm2, %v5674_v61, 0.0  ;;  %v5676_v23 = vpop.eup %5675 }
0x1d52   : > { %4044 = vadd.xlane.f32.xlu1 %v4043_v17  ;;  %v4040_v18 = vsel %vm978_vm2, %v5676_v23, 0.0 }
0x1d56   : > { %4041 = vadd.xlane.f32.xlu1 %v4040_v18 }
0x1d59   : > { %v5678_v42 = vpop.eup %5677 }
0x1d5a   : > { %v4049_v47 = vsel %vm978_vm2, %v5678_v42, 0.0  ;;  %v5680_v19 = vpop.eup %5679 }
0x1d5b   : > { %4050 = vadd.xlane.f32.xlu1 %v4049_v47  ;;  %v4046_v1 = vsel %vm978_vm2, %v5680_v19, 0.0 }
0x1d5f   : > { %4047 = vadd.xlane.f32.xlu1 %v4046_v1 }
0x1d70   : > { %4060 = vrot.lane.b32.xlu1 %v6473_v48, %s5764_s24  ;;  %v3001_v48 = vadd.f32 %v6523_v5, %v6401_v16 }
0x1d72   : > { %v3004_v24 = vadd.f32 %v5695_v43, %v3001_v48 }
0x1d74   : > { %4062 = vrot.lane.b32.xlu1 %v6469_v54, %s5764_s24  ;;  %v3435_v54 = vadd.f32 %v6523_v5, %v6455_v31 }
0x1d76   : > { %v3438_v44 = vadd.f32 %v5696_v2, %v3435_v54 }
0x1d78   : > { %2138 = vrot.lane.b32.xlu1 %v2136_v26, %s5769_s4 }
0x1d7c   : > { %2572 = vrot.lane.b32.xlu1 %v2570_v21, %s5770_s5 }
0x1d80   : > { %3006 = vrot.lane.b32.xlu1 %v3004_v24, %s5764_s24  ;;  %s4563_s24 = sshll.u32 %s5810_s13, 6  ;;  %s5773_s13 = smov [#allocation2]  }
0x1d81   : > { %s6582_s17 = scalar_lea.hbm %s6629_s2, %s4563_s24  ;;  %s5703_s25 = sshll.u32 %s5773_s13, 4  ;;  %s5704_s25 = int_to_ptr.vmem [resolvable:$false] %s5703_s25 }
0x1d82   : > { %s5705_s26 = scalar_lea.vmem %s5704_s25, 128  ;;  %p5706_p0 = scmp.lt.s32.totalorder %s6584_s7, %s5704_s25 }
0x1d83   : > { %p5707_p1 = scmp.lt.s32.totalorder %s5705_s26, %s5699_s22 }
0x1d84   : > { %3440 = vrot.lane.b32.xlu1 %v3438_v44, %s5771_s6 }
0x1d85   : > { %p5708_p2 = por %p5707_p1, %p5706_p0 }
0x1d87   : > { %p5709_p3 = pnand %p5708_p2, %p5702_p13 }
0x1d88   : > { %3874 = vrot.lane.b32.xlu1 %v3872_v36, %s5763_s23  ;;  %s5772_s23 = smov 112  }
0x1ddf   : > { %v4045_v16 = vpop.xlane.xlu1 %4044 }
0x1de0   : > { %5681 = vrcp.f32 %v4045_v16 }
0x1de3   : > { %v4042_v53 = vpop.xlane.xlu1 %4041 }
0x1de4   : > { %5683 = vrcp.f32 %v4042_v53 }
0x1de8   : > { %v4051_v8 = vpop.xlane.xlu1 %4050 }
0x1de9   : > { %5685 = vrcp.f32 %v4051_v8 }
0x1dea   : > { %v5682_v31 = vpop.eup %5681 }
0x1deb   : > { %v4057_v37 = vmul.f32 %v5682_v31, %v5674_v61 }
0x1dec   : > { %v4048_v12 = vpop.xlane.xlu1 %4047 }
0x1ded   : > { %5687 = vrcp.f32 %v4048_v12 }
0x1dee   : > { %v5684_v56 = vpop.eup %5683 }
0x1def   : > { %v4056_v45 = vmul.f32 %v5684_v56, %v5676_v23 }
0x1df0   : > { %v4061_v35 = vpop.permute.xlu1 %4060 }
0x1df1   : > { %5215 = vmatprep.mubr.msk.f32.mxu1 %vm978_vm2, %v4061_v35  ;;  %v5449_v57 = vpack.c.bf16 %v4057_v37, %v4056_v45 }
0x1df3   : > { %5451 = vmatprep.subr.msk.bf16.mxu1 %vm6141_vm3, %v5449_v57  ;;  %v5686_v51 = vpop.eup %5685 }
0x1df4   : > { %5454 = vmatpush3.bf16.xpose.msk.msra.mxu1 %vm6141_vm3, %v5449_v57  ;;  %v4063_v63 = vpop.permute.xlu1 %4062  ;;  %v4059_v40 = vmul.f32 %v5686_v51, %v5678_v42 }
0x1df7   : > { %v5688_v50 = vpop.eup %5687 }
0x1df8   : > { %v2139_v3 = vpop.permute.xlu1 %2138  ;;  %v4058_v30 = vmul.f32 %v5688_v50, %v5680_v19 }
0x1df9   : > { %2142 = vst.msk [vmem:[%s6220_s21] sm:$0x7] %vm2141_vm7, %v2139_v3 }
0x1dfa   : > { %v5455_v39 = vpack.c.bf16 %v4059_v40, %v4058_v30 }
0x1dfc   : > { %5457 = vmatprep.subr.msk.bf16.mxu1 %vm6141_vm3, %v5455_v39  ;;  %v2573_v62 = vpop.permute.xlu1 %2572 }
0x1dfd   : > { %2576 = vst.msk [vmem:[%s6220_s21] sm:$0x7] %vm2575_vm8, %v2573_v62  ;;  %5460 = vmatpush3.bf16.xpose.msk.msra.mxu1 %vm6141_vm3, %v5455_v39 }
0x1e00   : > { %v3007_v38 = vpop.permute.xlu1 %3006 }
0x1e01   : > { %3010 = vst.msk [vmem:[%s6220_s21] sm:$0x7] %vm3009_vm9, %v3007_v38 }
0x1e04   : > { %5216 = vmatmul.mubr.msk.f32.vlgmr.msra.gmra.mrb[52].mxu1 %vm978_vm2, %v4063_v63  ;;  %v3441_v7 = vpop.permute.xlu1 %3440 }
0x1e05   : > { %3444 = vst.msk [vmem:[%s6220_s21] sm:$0x7] %vm3443_vm10, %v3441_v7 }
0x1e08   : > { %v3875_v33 = vpop.permute.xlu1 %3874 }
0x1e09   : > { %3878 = vst.msk [vmem:[%s6220_s21] sm:$0x7] %vm3877_vm11, %v3875_v33 }
0x1ed7   : > { %v5217_v9 = vpop.f32.mrb[52].mxu1 }
0x1ed8   : > { %v4146_v11 = vpop.f32.mrb[53].mxu1 }
0x1ed9   : > { %5226 = vmatprep.mubr.msk.f32.mxu0 %vm978_vm2, %v4146_v11 }
0x1eda   : > { %5227 = vmatmul.mubr.msk.f32.vlgmr.msra.gmra.mrb[86].mxu0 %vm978_vm2, %v5217_v9 }
0x1edb   : > { %5233 = vmatprep.mubr.msk.f32.mxu0 %vm5766_vm4, %v5767_v28 }
0x1fad   : > { %v5228_v10 = vpop.f32.mrb[86].mxu0 }
0x1fae   : > { %v4227_v41 = vpop.f32.mrb[87].mxu0 }
0x1faf   : > { %v5470_v29 = vpack.c.bf16 %v5228_v10, %v4227_v41 }
0x1fb1   : > { %5471 = vmatpush3.bf16.msra.mxu0 %v5470_v29 }
0x1fb4   : > { %5234 = vmatmul.mubr.msk.f32.vlgmr.msra.gmra.mrb[88].mxu0 %vm519_vm1, %v6501_v0 }
0x2087   : > { %v4302_v13 = vpop.f32.mrb[88].mxu0 }
0x2088   : > { %v4303_v22 = vadd.f32 %v6523_v5, %v4302_v13  ;;  %v5235_v32 = vpop.f32.mrb[89].mxu0 }
0x208a   : > { %v4306_v27 = vadd.f32 %v5698_v14, %v4303_v22 }
0x208c   : > { %4308 = vrot.lane.b32.xlu0 %v4306_v27, %s5772_s23 }
0x20fe   : > { %v4309_v28 = vpop.permute.xlu0 %4308 }
0x20ff   : > { %4312 = vst.msk [vmem:[%s6220_s21] sm:$0x7] %vm4311_vm12, %v4309_v28 }
0x2100   : > { %5712 = shalt.err (!%p5709_p3)
}
0x2101   : > { %s5713_s8 = scalar_lea.hbm %s6582_s17, 64  ;;  %s5717_s28 = scalar_lea.hbm %s6629_s2, 128 }
0x2102   : > { %p5714_p4 = scmp.ne.s32.totalorder %s6582_s17, %s5713_s8  ;;  %p5718_p9 = scmp.lt.u32.totalorder %s6582_s17, %s6629_s2 }
0x2103   : > { %p5719_p10 = scmp.lt.u32.totalorder %s5717_s28, %s5713_s8  ;;  %p5721_p12 = scmp.lt.u32.totalorder %s5713_s8, %s6582_s17 }
0x2104   : > { %p5715_p7 = pnand %p5714_p4, %p5827_p5 }
0x2105   : > { %p5720_p11 = por %p5719_p10, %p5718_p9 }
0x2106   : > { %p5716_p8 = pneg %p5715_p7 }
0x2107   : > { %p5722_p13 = por %p5721_p12, %p5720_p11 }
0x2109   : > { %p5723_p0 = pnand %p5722_p13, %p5716_p8 }
0x210b   : > { %5726 = shalt.err (!%p5723_p0)
}
0x210c   : > { %5472 = dma.vmem_to_hbm [thread:$0]  (%p5827_p5), %s6584_s7, 64, %s6582_s17, %s4314_s3  }
0x210d PF: > { %p5478_p1 = scmp.ge.s32.totalorder %s5761_s12, 2  ;;  %s4339_s4 = sand.u32 1, %s5749_s9  }
0x210e   : > { %s4340_s5 = scalar_lea.sflag [#allocation3], %s4339_s4 }
0x210f   : > { %p5475_p2 = pnand %p5478_p1, %p5831_p6 }
0x2111   : > { %5744 = dma.done.wait (!%p5475_p2), %s4340_s5, 64  }
0x2112   : > { %5746 = vsyncadd (!%p5475_p2), %s4340_s5, 4294967232  ;;  %p12_p3 = scmp.ge.s32.totalorder %s5814_s15, 4   ;;  %s6634_s9 = smov %s5753_s10 }
0x2113   : > { %s6635_s10 = smov %s5757_s11  ;;  %s6636_s11 = smov %s5825_s18 }
0x2114   : > { %s6637_s12 = smov %s5814_s15  ;;  %14 = sbr.rel (!%p12_p3) target bundleno = 3 (0x3), region = 63 }
0x211b   :  { %4345 = vsyncpa [#allocation3], 1 }
0x211c   :  { %4347 = vsyncpa [#allocation3 + $0x1], 1 }

</bundles_post_ra>
